<compile_context>
chip_gen: v6e
topology: v6e:2x2x1
jax: 0.10.0
libtpu: 0.0.40
codegen_flags: <defaults>
</compile_context>

<pallas_src>
import functools

import numpy as np
import jax
import jax.numpy as jnp
from jax import lax
from jax.experimental import pallas as pl
from jax.experimental.pallas import tpu as pltpu

KERNEL_SIZE = 11
SIGMA = 1.5
K1, K2 = 0.01, 0.03
LANE = 128


def _gauss_1d():
    # matches torchmetrics._gaussian(kernel_size=11, sigma=1.5)
    dist = np.arange((1 - KERNEL_SIZE) / 2.0, (1 + KERNEL_SIZE) / 2.0, 1.0)
    g = np.exp(-((dist / SIGMA) ** 2) / 2.0)
    return (g / g.sum()).astype(np.float64)


GAUSS = _gauss_1d()  # deterministic, baked into the band matrices


def _round_up(x, m):
    return (x + m - 1) // m * m


def _band_matrices(H, W, Wo_pad):
    """Dense band matrices for the separable valid Gaussian convolution.

    B_W is zero-padded to Wo_pad lanes so all downstream work is lane-aligned
    (padded columns are exactly zero and masked out of the partial sums).
    """
    Ho = H - KERNEL_SIZE + 1
    Wo = W - KERNEL_SIZE + 1
    g = GAUSS.astype(np.float32)
    b_w = np.zeros((W, Wo_pad), np.float32)        # horizontal pass:  x @ B_W
    for c in range(Wo):
        b_w[c:c + KERNEL_SIZE, c] = g
    b_h = np.zeros((Ho, H), np.float32)            # vertical pass:    B_H @ x
    for r in range(Ho):
        b_h[r, r:r + KERNEL_SIZE] = g
    return jnp.asarray(b_w), jnp.asarray(b_h)


def _vmem_capacity_bytes():
    try:
        return int(pltpu.get_tpu_info().vmem_capacity_bytes)
    except Exception:
        return 64 * 1024 * 1024                    # v7x-safe fallback


def _choose_planes_per_step(P, H, W, in_itemsize, Wo_pad, budget_bytes,
                            max_planes=16, min_steps=4):
    """Pick planes-per-grid-step G from an honest VMEM estimate.

    Keeps >= min_steps grid steps (2 TCs on v7x need >= 2x blocks for overlap)
    and prefers divisors of P; otherwise P is padded up to a multiple of G.
    """
    Ho = H - KERNEL_SIZE + 1

    resident = 2 * (W * Wo_pad + Ho * H) * 4       # B_W, B_H (+ pipeline buffer)

    def per_step_bytes(g):
        dma = 2 * 2 * g * H * W * in_itemsize      # pred+target, double-buffered
        ups = 2 * g * H * W * 4                    # f32 upcasts of p, t
        x5 = 5 * g * H * W * 4                     # stacked conv operands
        hx = 5 * g * H * Wo_pad * 4                # horizontal-pass output
        bh_b = 5 * g * Ho * H * 4                  # broadcast B_H (batched lhs)
        v = 5 * g * Ho * Wo_pad * 4                # vertical-pass output
        tail = 3 * g * Ho * Wo_pad * 4             # elementwise temps / ssim map
        return dma + ups + x5 + hx + bh_b + v + tail

    g_vmem = 1
    for g in range(1, max_planes + 1):
        if per_step_bytes(g) + resident <= budget_bytes:
            g_vmem = g
        else:
            break

    g_steps = max(1, P // min_steps)               # keep >= min_steps grid steps
    cap = max(1, min(max_planes, g_vmem, g_steps))

    best_div = max(g for g in range(1, cap + 1) if P % g == 0)
    if 2 * best_div >= cap:
        return best_div                            # divisor close enough to cap
    return cap                                     # non-divisor G -> pad planes


def _ssim_kernel(c_ref, bw_ref, bh_ref, p_ref, t_ref, o_ref, *,
                 G, H, W, Wo, Wo_pad, P):
    Ho = H - KERNEL_SIZE + 1
    f32 = jnp.float32
    hi = lax.Precision.HIGHEST    # bit-faithful f32 on the MXU (multi-pass)

    c1 = c_ref[0]
    c2 = c_ref[1]
    b_w = bw_ref[...]                               # (W, Wo_pad)
    b_h = bh_ref[...]                               # (Ho, H)

    p = p_ref[...].astype(f32)                      # (G, H, W)
    t = t_ref[...].astype(f32)

    # Stack the 5 conv operands along the row (M) axis: the whole horizontal
    # Gaussian pass is ONE MXU matmul (one B_W weight push, M = 5*G*H rows).
    x5 = jnp.concatenate(
        [p.reshape(G * H, W), t.reshape(G * H, W),
         (p * p).reshape(G * H, W), (t * t).reshape(G * H, W),
         (p * t).reshape(G * H, W)], axis=0)        # (5*G*H, W)

    hx = jnp.dot(x5, b_w, preferred_element_type=f32, precision=hi)
    hx = hx.reshape(5 * G, H, Wo_pad)

    # Vertical pass: ONE batched matmul over all 5*G filtered maps (the batch
    # dim carries plane index and quantity; no Python loop, no stacked copy,
    # lane dim stays Wo_pad-aligned throughout).
    bh_b = jnp.broadcast_to(b_h, (5 * G, Ho, H))
    v = lax.dot_general(bh_b, hx,
                        dimension_numbers=(((2,), (1,)), ((0,), (0,))),
                        preferred_element_type=f32, precision=hi)
    v = v.reshape(5, G, Ho, Wo_pad)                 # leading-axis slices = free

    mu_p, mu_t, s_pp, s_tt, s_pt = v[0], v[1], v[2], v[3], v[4]

    mu_pp = mu_p * mu_p
    mu_tt = mu_t * mu_t
    mu_pt = mu_p * mu_t

    sigma_p = s_pp - mu_pp
    sigma_t = s_tt - mu_tt
    sigma_pt = s_pt - mu_pt

    num = (2.0 * mu_pt + c1) * (2.0 * sigma_pt + c2)
    den = (mu_pp + mu_tt + c1) * (sigma_p + sigma_t + c2)
    # exact division kept for fidelity to torchmetrics (approx reciprocal is a
    # small, free EUP win once validated against the reference)
    ssim_map = num / den                            # (G, Ho, Wo_pad)

    # Mask padded lanes (>= Wo) and padded planes (>= P) out of the partial sum.
    base = pl.program_id(0) * G
    plane_ok = (base + lax.broadcasted_iota(jnp.int32, (G, Ho, Wo_pad), 0)) < P
    lane_ok = lax.broadcasted_iota(jnp.int32, (G, Ho, Wo_pad), 2) < Wo
    total = jnp.sum(jnp.where(plane_ok & lane_ok, ssim_map, 0.0))

    # Lane-dense per-step partial: scalar in element (0,0,0), zeros elsewhere
    # -> unmasked, aligned vector store.
    at0 = ((lax.broadcasted_iota(jnp.int32, (1, 8, LANE), 1) == 0) &
           (lax.broadcasted_iota(jnp.int32, (1, 8, LANE), 2) == 0))
    o_ref[...] = jnp.where(at0, total, 0.0)


def ssim_loss(pred, target):
    if pred.shape != target.shape:
        # TODO(synk): F.interpolate default 'nearest' indexing may differ from
        # jax.image.resize('nearest') by one-pixel rounding at odd scale factors.
        new_shape = target.shape[:-2] + pred.shape[-2:]
        target = jax.image.resize(target, new_shape, method="nearest")

    N, C, H, W = pred.shape
    if H < KERNEL_SIZE or W < KERNEL_SIZE:
        raise ValueError(f"SSIM needs H, W >= {KERNEL_SIZE}, got {(H, W)}")
    Ho = H - KERNEL_SIZE + 1
    Wo = W - KERNEL_SIZE + 1
    Wo_pad = LANE if Wo <= LANE else _round_up(Wo, 2 * LANE)   # 256-aligned when big
    P = N * C

    # data_range=None default in torchmetrics: max of the two peak-to-peak
    # ranges.  The sibling min/max reductions of each tensor fuse into a single
    # HBM pass under XLA multi-output fusion.
    pr = pred.max().astype(jnp.float32) - pred.min().astype(jnp.float32)
    tr = target.max().astype(jnp.float32) - target.min().astype(jnp.float32)
    data_range = jnp.maximum(pr, tr)
    c1 = (K1 * data_range) ** 2
    c2 = (K2 * data_range) ** 2
    consts = jnp.stack([c1, c2]).astype(jnp.float32)            # -> SMEM

    b_w, b_h = _band_matrices(H, W, Wo_pad)

    # Per-generation VMEM sizing (~75% of physical as the compiler limit, half
    # of that as the planning budget for the conservative per-step estimate).
    vmem_limit = int(_vmem_capacity_bytes() * 0.75)
    G = _choose_planes_per_step(P, H, W, pred.dtype.itemsize, Wo_pad,
                                budget_bytes=vmem_limit // 2)
    num_blocks = -(-P // G)
    P_pad = num_blocks * G

    # Fold N*C into one plane axis; keep original dtype (cast happens in-kernel).
    pred_p = pred.reshape(P, H, W)
    targ_p = target.reshape(P, H, W)
    if P_pad != P:                                  # non-divisor G: zero-pad planes
        pad = ((0, P_pad - P), (0, 0), (0, 0))
        pred_p = jnp.pad(pred_p, pad)
        targ_p = jnp.pad(targ_p, pad)

    kernel = functools.partial(_ssim_kernel, G=G, H=H, W=W,
                               Wo=Wo, Wo_pad=Wo_pad, P=P)

    # TODO(synk): for large planes (>= ~512^2) replace the dense band matrices
    # with diagonally-tiled block-band matmuls and add H-tiling with a 10-row
    # halo so the per-step working set stays inside v7x's 64 MiB VMEM.
    partials = pl.pallas_call(
        kernel,
        grid=(num_blocks,),
        in_specs=[
            pl.BlockSpec(memory_space=pltpu.MemorySpace.SMEM),      # c1, c2 scalars
            pl.BlockSpec((W, Wo_pad), lambda b: (0, 0)),            # B_W (resident)
            pl.BlockSpec((Ho, H), lambda b: (0, 0)),                # B_H (resident)
            pl.BlockSpec((G, H, W), lambda b: (b, 0, 0)),           # pred planes
            pl.BlockSpec((G, H, W), lambda b: (b, 0, 0)),           # target planes
        ],
        out_specs=pl.BlockSpec((1, 8, LANE), lambda b: (b, 0, 0)),  # per-block sum
        out_shape=jax.ShapeDtypeStruct((num_blocks, 8, LANE), jnp.float32),
        compiler_params=pltpu.CompilerParams(
            dimension_semantics=("parallel",),
            vmem_limit_bytes=vmem_limit,
        ),
    )(consts, b_w, b_h, pred_p, targ_p)

    # per-plane means all have the same element count -> global mean is identical
    ssim_mean = jnp.sum(partials) / (P * Ho * Wo)
    return 1.0 - ssim_mean


if __name__ == "__main__":
    key = jax.random.PRNGKey(0)
    k1, k2 = jax.random.split(key)
    pred = jax.random.uniform(k1, (2, 4, 16, 16), dtype=jnp.float32)
    target = jax.random.uniform(k2, (2, 4, 16, 16), dtype=jnp.float32)

    loss = jax.jit(ssim_loss)(pred, target)
    jax.block_until_ready(loss)
    print("KERNEL_OK")
</pallas_src>

<mosaic_0001>
module attributes {stable_mosaic.version = 11 : i64} {
  func.func @_ssim_kernel(%arg0: i32, %arg1: memref<2xf32, #tpu.memory_space<smem>>, %arg2: memref<16x128xf32, #tpu.memory_space<vmem>>, %arg3: memref<6x16xf32, #tpu.memory_space<vmem>>, %arg4: memref<2x16x16xf32, #tpu.memory_space<vmem>>, %arg5: memref<2x16x16xf32, #tpu.memory_space<vmem>>, %arg6: memref<1x8x128xf32, #tpu.memory_space<vmem>>) attributes {dimension_semantics = [#tpu.dimension_semantics<parallel>], iteration_bounds = array<i64: 4>, scalar_prefetch = 0 : i64, scratch_operands = 0 : i64, tpu.core_type = #tpu.core_type<tc>, window_params = [{transform_indices = @transform_0, window_bounds = array<i64: 2>}, {pipeline_mode = #tpu.pipeline_mode<synchronous>, transform_indices = @transform_1, window_bounds = array<i64: 16, 128>}, {pipeline_mode = #tpu.pipeline_mode<synchronous>, transform_indices = @transform_2, window_bounds = array<i64: 6, 16>}, {transform_indices = @transform_3, window_bounds = array<i64: 2, 16, 16>}, {transform_indices = @transform_4, window_bounds = array<i64: 2, 16, 16>}, {transform_indices = @transform_5, window_bounds = array<i64: 1, 8, 128>}]} {
    %c0 = arith.constant 0 : index
    %0 = memref.load %arg1[%c0] : memref<2xf32, #tpu.memory_space<smem>>
    %c1 = arith.constant 1 : index
    %1 = memref.load %arg1[%c1] : memref<2xf32, #tpu.memory_space<smem>>
    %c0_0 = arith.constant 0 : index
    %c0_1 = arith.constant 0 : index
    %2 = vector.load %arg2[%c0_0, %c0_1] : memref<16x128xf32, #tpu.memory_space<vmem>>, vector<16x128xf32>
    %c0_2 = arith.constant 0 : index
    %c0_3 = arith.constant 0 : index
    %3 = vector.load %arg3[%c0_2, %c0_3] : memref<6x16xf32, #tpu.memory_space<vmem>>, vector<6x16xf32>
    %c0_4 = arith.constant 0 : index
    %c0_5 = arith.constant 0 : index
    %c0_6 = arith.constant 0 : index
    %4 = vector.load %arg4[%c0_4, %c0_5, %c0_6] : memref<2x16x16xf32, #tpu.memory_space<vmem>>, vector<2x16x16xf32>
    %c0_7 = arith.constant 0 : index
    %c0_8 = arith.constant 0 : index
    %c0_9 = arith.constant 0 : index
    %5 = vector.load %arg5[%c0_7, %c0_8, %c0_9] : memref<2x16x16xf32, #tpu.memory_space<vmem>>, vector<2x16x16xf32>
    %6 = vector.shape_cast %4 : vector<2x16x16xf32> to vector<32x16xf32>
    %7 = vector.shape_cast %5 : vector<2x16x16xf32> to vector<32x16xf32>
    %8 = arith.mulf %4, %4 : vector<2x16x16xf32>
    %9 = vector.shape_cast %8 : vector<2x16x16xf32> to vector<32x16xf32>
    %10 = arith.mulf %5, %5 : vector<2x16x16xf32>
    %11 = vector.shape_cast %10 : vector<2x16x16xf32> to vector<32x16xf32>
    %12 = arith.mulf %4, %5 : vector<2x16x16xf32>
    %13 = vector.shape_cast %12 : vector<2x16x16xf32> to vector<32x16xf32>
    %14 = tpu.concatenate %6, %7, %9, %11, %13 in 0 : vector<32x16xf32>, vector<32x16xf32>, vector<32x16xf32>, vector<32x16xf32>, vector<32x16xf32> -> vector<160x16xf32>
    %cst = arith.constant dense<0.000000e+00> : vector<160x128xf32>
    %15 = tpu.matmul %14, %2, %cst {dimension_numbers = #tpu.dot_dimension_numbers<[1], [0], [0], [1], [0, 0, 1, 1], [], []>, precision = #tpu.contract_precision<fp32>} : vector<160x16xf32>, vector<16x128xf32>, vector<160x128xf32> -> vector<160x128xf32>
    %16 = vector.shape_cast %15 : vector<160x128xf32> to vector<10x16x128xf32>
    %17 = vector.shape_cast %3 : vector<6x16xf32> to vector<1x6x16xf32>
    %18 = vector.broadcast %17 : vector<1x6x16xf32> to vector<10x6x16xf32>
    %cst_10 = arith.constant dense<0.000000e+00> : vector<10x6x128xf32>
    %19 = tpu.matmul %18, %16, %cst_10 {dimension_numbers = #tpu.dot_dimension_numbers<[2], [1], [1], [2], [0, 0, 0, 1, 1, 2], [0], [0]>, precision = #tpu.contract_precision<fp32>} : vector<10x6x16xf32>, vector<10x16x128xf32>, vector<10x6x128xf32> -> vector<10x6x128xf32>
    %20 = vector.shape_cast %19 : vector<10x6x128xf32> to vector<5x2x6x128xf32>
    %21 = vector.extract_strided_slice %20 {offsets = [0, 0, 0, 0], sizes = [1, 2, 6, 128], strides = [1, 1, 1, 1]} : vector<5x2x6x128xf32> to vector<1x2x6x128xf32>
    %22 = vector.shape_cast %21 : vector<1x2x6x128xf32> to vector<2x6x128xf32>
    %23 = vector.extract_strided_slice %20 {offsets = [1, 0, 0, 0], sizes = [1, 2, 6, 128], strides = [1, 1, 1, 1]} : vector<5x2x6x128xf32> to vector<1x2x6x128xf32>
    %24 = vector.shape_cast %23 : vector<1x2x6x128xf32> to vector<2x6x128xf32>
    %25 = vector.extract_strided_slice %20 {offsets = [2, 0, 0, 0], sizes = [1, 2, 6, 128], strides = [1, 1, 1, 1]} : vector<5x2x6x128xf32> to vector<1x2x6x128xf32>
    %26 = vector.shape_cast %25 : vector<1x2x6x128xf32> to vector<2x6x128xf32>
    %27 = vector.extract_strided_slice %20 {offsets = [3, 0, 0, 0], sizes = [1, 2, 6, 128], strides = [1, 1, 1, 1]} : vector<5x2x6x128xf32> to vector<1x2x6x128xf32>
    %28 = vector.shape_cast %27 : vector<1x2x6x128xf32> to vector<2x6x128xf32>
    %29 = vector.extract_strided_slice %20 {offsets = [4, 0, 0, 0], sizes = [1, 2, 6, 128], strides = [1, 1, 1, 1]} : vector<5x2x6x128xf32> to vector<1x2x6x128xf32>
    %30 = vector.shape_cast %29 : vector<1x2x6x128xf32> to vector<2x6x128xf32>
    %31 = arith.mulf %22, %22 : vector<2x6x128xf32>
    %32 = arith.mulf %24, %24 : vector<2x6x128xf32>
    %33 = arith.mulf %22, %24 : vector<2x6x128xf32>
    %34 = arith.subf %26, %31 : vector<2x6x128xf32>
    %35 = arith.subf %28, %32 : vector<2x6x128xf32>
    %36 = arith.subf %30, %33 : vector<2x6x128xf32>
    %cst_11 = arith.constant 2.000000e+00 : f32
    %37 = vector.broadcast %cst_11 : f32 to vector<2x6x128xf32>
    %38 = arith.mulf %37, %33 : vector<2x6x128xf32>
    %39 = vector.broadcast %0 : f32 to vector<2x6x128xf32>
    %40 = arith.addf %38, %39 : vector<2x6x128xf32>
    %cst_12 = arith.constant 2.000000e+00 : f32
    %41 = vector.broadcast %cst_12 : f32 to vector<2x6x128xf32>
    %42 = arith.mulf %41, %36 : vector<2x6x128xf32>
    %43 = vector.broadcast %1 : f32 to vector<2x6x128xf32>
    %44 = arith.addf %42, %43 : vector<2x6x128xf32>
    %45 = arith.mulf %40, %44 : vector<2x6x128xf32>
    %46 = arith.addf %31, %32 : vector<2x6x128xf32>
    %47 = vector.broadcast %0 : f32 to vector<2x6x128xf32>
    %48 = arith.addf %46, %47 : vector<2x6x128xf32>
    %49 = arith.addf %34, %35 : vector<2x6x128xf32>
    %50 = vector.broadcast %1 : f32 to vector<2x6x128xf32>
    %51 = arith.addf %49, %50 : vector<2x6x128xf32>
    %52 = arith.mulf %48, %51 : vector<2x6x128xf32>
    %53 = arith.divf %45, %52 : vector<2x6x128xf32>
    %c2_i32 = arith.constant 2 : i32
    %54 = arith.muli %arg0, %c2_i32 : i32
    %55 = tpu.iota {dimensions = array<i32: 0>} : vector<2x6x128xi32>
    %56 = vector.broadcast %54 : i32 to vector<2x6x128xi32>
    %57 = arith.addi %56, %55 : vector<2x6x128xi32>
    %c8_i32 = arith.constant 8 : i32
    %58 = vector.broadcast %c8_i32 : i32 to vector<2x6x128xi32>
    %59 = arith.cmpi slt, %57, %58 : vector<2x6x128xi32>
    %60 = tpu.iota {dimensions = array<i32: 2>} : vector<2x6x128xi32>
    %c6_i32 = arith.constant 6 : i32
    %61 = vector.broadcast %c6_i32 : i32 to vector<2x6x128xi32>
    %62 = arith.cmpi slt, %60, %61 : vector<2x6x128xi32>
    %63 = arith.andi %59, %62 : vector<2x6x128xi1>
    %cst_13 = arith.constant 0.000000e+00 : f32
    %64 = vector.broadcast %cst_13 : f32 to vector<2x6x128xf32>
    %65 = arith.select %63, %53, %64 : vector<2x6x128xi1>, vector<2x6x128xf32>
    %66 = vector.shape_cast %65 : vector<2x6x128xf32> to vector<1x2x6x128xf32>
    %cst_14 = arith.constant dense<0.000000e+00> : vector<1xf32>
    %67 = vector.multi_reduction <add>, %66, %cst_14 [1, 2, 3] : vector<1x2x6x128xf32> to vector<1xf32>
    %68 = vector.shape_cast %67 : vector<1xf32> to vector<1x1x1x1xf32>
    %69 = vector.extract %68[0, 0, 0, 0] : f32 from vector<1x1x1x1xf32>
    %70 = tpu.iota {dimensions = array<i32: 1>} : vector<1x8x128xi32>
    %c0_i32 = arith.constant 0 : i32
    %71 = vector.broadcast %c0_i32 : i32 to vector<1x8x128xi32>
    %72 = arith.cmpi eq, %70, %71 : vector<1x8x128xi32>
    %73 = tpu.iota {dimensions = array<i32: 2>} : vector<1x8x128xi32>
    %c0_i32_15 = arith.constant 0 : i32
    %74 = vector.broadcast %c0_i32_15 : i32 to vector<1x8x128xi32>
    %75 = arith.cmpi eq, %73, %74 : vector<1x8x128xi32>
    %76 = arith.andi %72, %75 : vector<1x8x128xi1>
    %cst_16 = arith.constant 0.000000e+00 : f32
    %77 = vector.broadcast %69 : f32 to vector<1x8x128xf32>
    %78 = vector.broadcast %cst_16 : f32 to vector<1x8x128xf32>
    %79 = arith.select %76, %77, %78 : vector<1x8x128xi1>, vector<1x8x128xf32>
    %c0_17 = arith.constant 0 : index
    %c0_18 = arith.constant 0 : index
    %c0_19 = arith.constant 0 : index
    %80 = vector.load %arg6[%c0_17, %c0_18, %c0_19] : memref<1x8x128xf32, #tpu.memory_space<vmem>>, vector<1x8x128xf32>
    tpu.vector_store %arg6[%c0_17, %c0_18, %c0_19], %79 {strides = array<i32>} : memref<1x8x128xf32, #tpu.memory_space<vmem>>, vector<1x8x128xf32>,
    return
  }
  func.func @transform_0(%arg0: i32) -> i32 {
    %c0_i32 = arith.constant 0 : i32
    %c0_i32_0 = arith.constant 0 : i32
    return %c0_i32 : i32
  }
  func.func @transform_1(%arg0: i32) -> (i32, i32) {
    %c0_i32 = arith.constant 0 : i32
    %c0_i32_0 = arith.constant 0 : i32
    %c0_i32_1 = arith.constant 0 : i32
    return %c0_i32, %c0_i32_0 : i32, i32
  }
  func.func @transform_2(%arg0: i32) -> (i32, i32) {
    %c0_i32 = arith.constant 0 : i32
    %c0_i32_0 = arith.constant 0 : i32
    %c0_i32_1 = arith.constant 0 : i32
    return %c0_i32, %c0_i32_0 : i32, i32
  }
  func.func @transform_3(%arg0: i32) -> (i32, i32, i32) {
    %c0_i32 = arith.constant 0 : i32
    %c0_i32_0 = arith.constant 0 : i32
    %c0_i32_1 = arith.constant 0 : i32
    return %arg0, %c0_i32, %c0_i32_0 : i32, i32, i32
  }
  func.func @transform_4(%arg0: i32) -> (i32, i32, i32) {
    %c0_i32 = arith.constant 0 : i32
    %c0_i32_0 = arith.constant 0 : i32
    %c0_i32_1 = arith.constant 0 : i32
    return %arg0, %c0_i32, %c0_i32_0 : i32, i32, i32
  }
  func.func @transform_5(%arg0: i32) -> (i32, i32, i32) {
    %c0_i32 = arith.constant 0 : i32
    %c0_i32_0 = arith.constant 0 : i32
    %c0_i32_1 = arith.constant 0 : i32
    return %arg0, %c0_i32, %c0_i32_0 : i32, i32, i32
  }
}

</mosaic_0001>

<bundles_post_ra>
// kernel: ssim_loss.1
= control target key start
LH: loop header
LB: loop body
LE: loop exit
PB: predicated region body
PF: predicated region fallthrough
CT: control target
= control target key end

     0   :  { %10 = vsyncpa [#allocation3], 0  ;;  %s7413_s18 = smov 0   ;;  %s8462_s0 = inlined_call_operand.vmem [shape: f32[2], index: 0, kind: input, shape index: {}]   ;;  %s8463_s1 = inlined_call_operand.vmem [shape: f32[16,128], index: 1, kind: input, shape index: {}]   ;;  %s8464_s2 = inlined_call_operand.vmem [shape: f32[6,16], index: 2, kind: input, shape index: {}]   ;;  %s8465_s3 = inlined_call_operand.vmem [shape: f32[8,16,16], index: 3, kind: input, shape index: {}]   ;;  %s8466_s4 = inlined_call_operand.vmem [shape: f32[8,16,16], index: 4, kind: input, shape index: {}]   ;;  %s8467_s5 = inlined_call_operand.vmem [shape: f32[4,8,128], index: 5, kind: output, shape index: {}]  }
   0x1 LB: > { %s7419_s19 = sadd.s32 4294967295, %s7378_s18   ;;  %p6372_p0 = scmp.ge.s32.totalorder %s7378_s18, 1  ;;  %s7378_s18 = sphi %s7413_s18, %s16_s18  }
   0x2   : > { %p162_p1 = scmp.lt.s32.totalorder %s7378_s18, 5  ;;  %s175_s22 = sshll.u32 %s8462_s0, 4  ;;  %s176_s22 = int_to_ptr.vmem [resolvable:$true] %s175_s22 }
   0x3   : > { %p7336_p3 = scmp.eq.s32.totalorder %s7419_s19, 0  ;;  %s7353_s24 = scalar_lea.vmem %s176_s22, 16 }
   0x4   : > { %p7426_p2 = pnand %p6372_p0, %p162_p1  ;;  %p7354_p6 = scmp.ne.s32.totalorder %s176_s22, %s7353_s24 }
   0x5   : > { %p7361_p10 = scmp.lt.s32.totalorder %s176_s22, %s176_s22  ;;  %p7362_p11 = scmp.lt.s32.totalorder %s7353_s24, %s7353_s24 }
   0x6   : > { %p7332_p4 = pneg %p7426_p2 }
   0x7   : > { %p7363_p12 = por %p7362_p11, %p7361_p10 }
   0x8   : > { %p7333_p5 = pnand %p7336_p3, %p7332_p4 }
   0xa   : > { %p7355_p7 = pneg %p7333_p5 }
   0xc   : > { %p7356_p8 = pnand %p7355_p7, %p7354_p6 }
   0xe   : > { %p7357_p9 = pneg %p7356_p8 }
  0x10   : > { %p7364_p13 = pnand %p7363_p12, %p7357_p9 }
  0x12   : > { %7367 = shalt.err (!%p7364_p13)
}
  0x13   : > { %s7380_s25 = smov [#allocation2]   ;;  %214 = sbr.rel (%p7426_p2) target bundleno = 919 (0x397), region = 40 }
  0x14   : > { %7335 = dma.vmem_to_smem (!%p7333_p5), %s176_s22, 16, %s7380_s25, [#allocation3]  }
  0x18   : > { %7373 = dma.done.wait (%p7336_p3), [#allocation3], 16  }
  0x19   : > { %7375 = vsyncadd (%p7336_p3), [#allocation3], 4294967280 }
  0x1a   : > { %220 = sfence }
  0x1b   : > { %v270_v0 = vld [vmem:[%s8463_s1 + $0x8] sm:$0xff]  ;;  %v269_v1 = vld [vmem:[%s8463_s1] sm:$0xff]  ;;  %s7448_s30 = sshll.u32 %s7419_s19, 1  ;;  %vm292_vm0 = vcmask 130048   ;;  %vm7382_vm1 = vmmov 0   ;;  %s267_s16 = sld [smem:[#allocation2]] }
  0x1c   : > { %v7450_v2 = vand.u32 4294901760, %v270_v0  ;;  %v7452_v3 = vand.u32 4294901760, %v269_v1  ;;  %p250_p0 = scmp.lt.s32.totalorder %s7448_s30, 7  ;;  %s6384_s17 = sld [smem:[#allocation2 + $0x1]]  ;;  %vm6272_vm7 = vcmask 1045504  }
  0x1d   : > { %p263_p1 = scmp.lt.s32.totalorder %s7419_s19, 3 }
  0x1e   : > { %6702 = vmatprep.subr.mxu0 %v7450_v2  ;;  %v7457_v4 = vsub.f32 %v270_v0, %v7450_v2  ;;  %v7460_v5 = vsub.f32 %v269_v1, %v7452_v3  ;;  %s251_s6 = scalar_select %p250_p0, %s7448_s30, 7 }
  0x1f   : > { %6703 = vmatpush3.msra.mxu0 %v7450_v2  ;;  %s8490_s19 = smov (!%p263_p1, %s7419_s19), 3 }
  0x20   : > { %v7465_v6 = vand.u32 4294901760, %v7457_v4  ;;  %6704 = vmatprep.subr.mxu0 %v7452_v3  ;;  %v7469_v7 = vand.u32 4294901760, %v7460_v5  ;;  %s6388_s7 = sshll.u32 %s251_s6, 4  ;;  %s6383_s20 = sshll.u32 %s8490_s19, 3 }
  0x21   : > { %6705 = vmatpush3.msra.mxu0 %v7452_v3  ;;  %s254_s10 = scalar_lea.vmem %s8465_s3, %s6388_s7  ;;  %s261_s13 = scalar_lea.vmem %s8466_s4, %s6388_s7 }
  0x22   : > { %v652_v8 = vsub.f32 %v7457_v4, %v7465_v6  ;;  %v659_v9 = vsub.f32 %v7460_v5, %v7469_v7  ;;  %v272_v10 = vld [vmem:[%s254_s10] sm:$0xff]  ;;  %v7484_v12 = vld [vmem:[%s254_s10 + $0x8] sm:$0xff]  ;;  %6770 = vmatprep.subr.mxu0 %v7457_v4  ;;  %v7495_v17 = vld [vmem:[%s254_s10 + $0x10] sm:$0xff]  ;;  %s266_s23 = scalar_lea.vmem %s8467_s5, %s6383_s20 }
  0x23   : > { %v7482_v11 = vld [vmem:[%s261_s13] sm:$0xff]  ;;  %v7487_v13 = vmul.f32 %v272_v10, %v272_v10  ;;  %v294_v15 = vsel %vm292_vm0, %v272_v10, 0  ;;  %v297_v16 = vsel %vm292_vm0, %v7484_v12, 0  ;;  %v7497_v18 = vld [vmem:[%s254_s10 + $0x18] sm:$0xff]  ;;  %v7499_v19 = vld [vmem:[%s261_s13 + $0x8] sm:$0xff]  ;;  %v300_v26 = vsel %vm292_vm0, %v7495_v17, 0 }
  0x24   : > { %v7490_v14 = vmul.f32 %v7482_v11, %v272_v10  ;;  %v653_v20 = vand.u32 4294901760, %v652_v8  ;;  %v660_v21 = vand.u32 4294901760, %v659_v9  ;;  %v7501_v22 = vand.u32 4294901760, %v294_v15  ;;  %v7505_v24 = vld [vmem:[%s261_s13 + $0x10] sm:$0xff]  ;;  %v7507_v25 = vld [vmem:[%s261_s13 + $0x18] sm:$0xff] }
  0x25   : > { %v7503_v23 = vand.u32 4294901760, %v297_v16  ;;  %v303_v27 = vsel %vm292_vm0, %v7497_v18, 0  ;;  %v306_v28 = vsel %vm292_vm0, %v7482_v11, 0  ;;  %v309_v29 = vsel %vm292_vm0, %v7499_v19, 0 }
  0x26   : > { %6736 = vmatprep.subr.mxu1 %v653_v20  ;;  %v7518_v30 = vsub.f32 %v294_v15, %v7501_v22  ;;  %6740 = vmatprep.mubr.f32.mxu1 %v7501_v22  ;;  %v7524_v32 = vand.u32 4294901760, %v300_v26  ;;  %v7526_v33 = vand.u32 4294901760, %v303_v27  ;;  %v7528_v34 = vand.u32 4294901760, %v306_v28 }
  0x27   : > { %v7522_v31 = vsub.f32 %v297_v16, %v7503_v23  ;;  %6737 = vmatpush3.msra.mxu1 %v653_v20  ;;  %v7530_v35 = vand.u32 4294901760, %v309_v29  ;;  %v312_v36 = vsel %vm292_vm0, %v7505_v24, 0  ;;  %v315_v37 = vsel %vm292_vm0, %v7507_v25, 0 }
  0x28   : > { %6738 = vmatprep.subr.mxu1 %v660_v21  ;;  %v422_v38 = vand.u32 4294901760, %v7518_v30  ;;  %v7539_v40 = vsub.f32 %v300_v26, %v7524_v32  ;;  %v7542_v41 = vsub.f32 %v303_v27, %v7526_v33  ;;  %v7545_v42 = vsub.f32 %v306_v28, %v7528_v34 }
  0x29   : > { %v432_v39 = vand.u32 4294901760, %v7522_v31  ;;  %6739 = vmatpush3.msra.mxu1 %v660_v21  ;;  %v7548_v43 = vsub.f32 %v309_v29, %v7530_v35  ;;  %v7550_v44 = vand.u32 4294901760, %v312_v36  ;;  %v7552_v45 = vand.u32 4294901760, %v315_v37 }
  0x2a   : > { %v423_v46 = vsub.f32 %v7518_v30, %v422_v38  ;;  %6741 = vmatmul.mubr.f32.vlgmr.msra.gmra.mxu1 %v7503_v23  ;;  %v442_v48 = vand.u32 4294901760, %v7539_v40  ;;  %v452_v49 = vand.u32 4294901760, %v7542_v41  ;;  %6804 = vmatprep.subr.mxu1 %v7450_v2  ;;  %v462_v50 = vand.u32 4294901760, %v7545_v42 }
  0x2b   : > { %v433_v47 = vsub.f32 %v7522_v31, %v432_v39  ;;  %6743 = vmatprep.mubr.f32.mxu1 %v7524_v32  ;;  %v472_v51 = vand.u32 4294901760, %v7548_v43  ;;  %v7568_v52 = vsub.f32 %v312_v36, %v7550_v44  ;;  %v7571_v53 = vsub.f32 %v315_v37, %v7552_v45  ;;  %6805 = vmatpush3.msra.mxu1 %v7450_v2 }
  0x2c   : > { %v424_v54 = vand.u32 4294901760, %v423_v46  ;;  %v443_v56 = vsub.f32 %v7539_v40, %v442_v48  ;;  %v453_v57 = vsub.f32 %v7542_v41, %v452_v49  ;;  %6806 = vmatprep.subr.mxu1 %v7452_v3  ;;  %v463_v58 = vsub.f32 %v7545_v42, %v462_v50 }
  0x2d   : > { %v434_v55 = vand.u32 4294901760, %v433_v47  ;;  %v473_v59 = vsub.f32 %v7548_v43, %v472_v51  ;;  %v8474_v60 = vand.u32 4294901760, %v7568_v52  ;;  %v8472_v61 = vand.u32 4294901760, %v7571_v53  ;;  %6807 = vmatpush3.msra.mxu1 %v7452_v3 }
  0x2e   : > { %6706 = vmatprep.mubr.f32.mxu0 %v424_v54  ;;  %v444_v62 = vand.u32 4294901760, %v443_v56  ;;  %v454_v63 = vand.u32 4294901760, %v453_v57  ;;  %6744 = vmatmul.mubr.f32.gmra.mxu1 %v7526_v33  ;;  %v318_v0 = vsel %vm292_vm0, %v7487_v13, 0  ;;  %v281_v1 = vmul.f32 %v7484_v12, %v7484_v12 }
  0x2f   : > { %6707 = vmatmul.mubr.f32.vlgmr.msra.gmra.mxu0 %v434_v55  ;;  %v464_v8 = vand.u32 4294901760, %v463_v58  ;;  %6746 = vmatprep.mubr.f32.mxu1 %v7528_v34  ;;  %v474_v9 = vand.u32 4294901760, %v473_v59  ;;  %v483_v10 = vsub.f32 %v7568_v52, %v8474_v60  ;;  %v493_v15 = vsub.f32 %v7571_v53, %v8472_v61 }
  0x30   : > { %6709 = vmatprep.mubr.f32.mxu0 %v444_v62  ;;  %v7602_v16 = vand.u32 4294901760, %v318_v0  ;;  %v321_v13 = vsel %vm292_vm0, %v281_v1, 0  ;;  %v282_v20 = vmul.f32 %v7495_v17, %v7495_v17  ;;  %v283_v21 = vmul.f32 %v7497_v18, %v7497_v18  ;;  %6771 = vmatpush3.msra.mxu0 %v7457_v4 }
  0x31   : > { %v484_v26 = vand.u32 4294901760, %v483_v10  ;;  %v494_v27 = vand.u32 4294901760, %v493_v15  ;;  %v7610_v28 = vand.u32 4294901760, %v321_v13  ;;  %v284_v29 = vmul.f32 %v7482_v11, %v7482_v11  ;;  %6772 = vmatprep.subr.mxu0 %v7460_v5  ;;  %6872 = vmatprep.subr.mxu1 %v7450_v2 }
  0x32   : > { %6747 = vmatmul.mubr.f32.gmra.mxu1 %v7530_v35  ;;  %v7618_v36 = vsub.f32 %v318_v0, %v7602_v16  ;;  %v324_v37 = vsel %vm292_vm0, %v282_v20, 0  ;;  %v327_v4 = vsel %vm292_vm0, %v283_v21, 0  ;;  %v285_v46 = vmul.f32 %v7499_v19, %v7499_v19  ;;  %6773 = vmatpush3.msra.mxu0 %v7460_v5 }
  0x33   : > { %6710 = vmatmul.mubr.f32.gmra.mxu0 %v454_v63  ;;  %6749 = vmatprep.mubr.f32.mxu1 %v7550_v44  ;;  %v7627_v11 = vsub.f32 %v321_v13, %v7610_v28  ;;  %v7629_v47 = vand.u32 4294901760, %v324_v37  ;;  %v7631_v54 = vand.u32 4294901760, %v327_v4  ;;  %v330_v55 = vsel %vm292_vm0, %v284_v29, 0 }
  0x34   : > { %6712 = vmatprep.mubr.f32.mxu0 %v464_v8  ;;  %v8471_v56 = vand.u32 4294901760, %v7618_v36  ;;  %v7635_v57 = vand.u32 4294901760, %v330_v55  ;;  %v333_v58 = vsel %vm292_vm0, %v285_v46, 0  ;;  %v286_v5 = vmul.f32 %v7505_v24, %v7505_v24  ;;  %6838 = vmatprep.subr.mxu0 %v7465_v6 }
  0x35   : > { %v8468_v59 = vand.u32 4294901760, %v7627_v11  ;;  %v7643_v62 = vsub.f32 %v324_v37, %v7629_v47  ;;  %v7646_v63 = vsub.f32 %v327_v4, %v7631_v54  ;;  %v7648_v0 = vand.u32 4294901760, %v333_v58 }
  0x36   : > { %6750 = vmatmul.mubr.f32.gmra.mxu1 %v7552_v45  ;;  %v503_v1 = vsub.f32 %v7618_v36, %v8471_v56  ;;  %v7655_v8 = vsub.f32 %v330_v55, %v7635_v57  ;;  %v336_v10 = vsel %vm292_vm0, %v286_v5, 0  ;;  %v287_v15 = vmul.f32 %v7507_v25, %v7507_v25 }
  0x37   : > { %6713 = vmatmul.mubr.f32.gmra.mxu0 %v474_v9  ;;  %6752 = vmatprep.mubr.f32.mxu1 %v7602_v16  ;;  %v513_v13 = vsub.f32 %v7627_v11, %v8468_v59  ;;  %v8469_v20 = vand.u32 4294901760, %v7643_v62  ;;  %v8470_v21 = vand.u32 4294901760, %v7646_v63  ;;  %v7667_v29 = vsub.f32 %v333_v58, %v7648_v0 }
  0x38   : > { %6715 = vmatprep.mubr.f32.mxu0 %v484_v26  ;;  %v504_v37 = vand.u32 4294901760, %v503_v1  ;;  %v8473_v4 = vand.u32 4294901760, %v7655_v8  ;;  %v7670_v46 = vand.u32 4294901760, %v336_v10  ;;  %v339_v9 = vsel %vm292_vm0, %v287_v15, 0 }
  0x39   : > { %v523_v55 = vsub.f32 %v7643_v62, %v8469_v20  ;;  %v533_v5 = vsub.f32 %v7646_v63, %v8470_v21  ;;  %v552_v59 = vand.u32 4294901760, %v7667_v29  ;;  %v7687_v1 = vand.u32 4294901760, %v339_v9 }
  0x3a   : > { %6753 = vmatmul.mubr.f32.gmra.mxu1 %v7610_v28  ;;  %v543_v26 = vsub.f32 %v7655_v8, %v8473_v4  ;;  %v7685_v58 = vsub.f32 %v336_v10, %v7670_v46  ;;  %v342_v15 = vsel %vm292_vm0, %v7490_v14, 0  ;;  %v514_v20 = vand.u32 4294901760, %v513_v13 }
  0x3b   : > { %6716 = vmatmul.mubr.f32.gmra.mxu0 %v494_v27  ;;  %6755 = vmatprep.mubr.f32.mxu1 %v7629_v47  ;;  %v7692_v21 = vand.u32 4294901760, %v342_v15  ;;  %v524_v56 = vand.u32 4294901760, %v523_v55  ;;  %v7696_v4 = vsub.f32 %v339_v9, %v7687_v1  ;;  %v289_v10 = vmul.f32 %v7499_v19, %v7484_v12 }
  0x3c   : > { %6718 = vmatprep.mubr.f32.mxu0 %v504_v37  ;;  %v562_v61 = vand.u32 4294901760, %v7685_v58  ;;  %v290_v14 = vmul.f32 %v7505_v24, %v7495_v17  ;;  %v291_v27 = vmul.f32 %v7507_v25, %v7497_v18  ;;  %v534_v13 = vand.u32 4294901760, %v533_v5 }
  0x3d   : > { %v7701_v60 = vsub.f32 %v342_v15, %v7692_v21  ;;  %v544_v37 = vand.u32 4294901760, %v543_v26  ;;  %v553_v9 = vsub.f32 %v7667_v29, %v552_v59  ;;  %v345_v55 = vsel %vm292_vm0, %v289_v10, 0 }
  0x3e   : > { %6756 = vmatmul.mubr.f32.gmra.mxu1 %v7631_v54  ;;  %v8475_v12 = vand.u32 4294901760, %v7696_v4  ;;  %v7714_v19 = vand.u32 4294901760, %v345_v55  ;;  %v348_v17 = vsel %vm292_vm0, %v290_v14, 0  ;;  %v351_v18 = vsel %vm292_vm0, %v291_v27, 0 }
  0x3f   : > { %6719 = vmatmul.mubr.f32.gmra.mxu0 %v514_v20  ;;  %6758 = vmatprep.mubr.f32.mxu1 %v7635_v57  ;;  %v563_v24 = vsub.f32 %v7685_v58, %v562_v61  ;;  %v8476_v25 = vand.u32 4294901760, %v7701_v60  ;;  %v7722_v5 = vand.u32 4294901760, %v348_v17  ;;  %v7724_v20 = vand.u32 4294901760, %v351_v18 }
  0x40   : > { %6721 = vmatprep.mubr.f32.mxu0 %v524_v56  ;;  %v7727_v26 = vsub.f32 %v345_v55, %v7714_v19  ;;  %v554_v56 = vand.u32 4294901760, %v553_v9  ;;  %v573_v10 = vsub.f32 %v7696_v4, %v8475_v12 }
  0x41   : > { %v7731_v15 = vsub.f32 %v348_v17, %v7722_v5  ;;  %v7739_v27 = vsub.f32 %v351_v18, %v7724_v20  ;;  %v564_v55 = vand.u32 4294901760, %v563_v24  ;;  %v583_v17 = vsub.f32 %v7701_v60, %v8476_v25 }
  0x42   : > { %6759 = vmatmul.mubr.f32.gmra.mxu1 %v7648_v0  ;;  %v8477_v14 = vand.u32 4294901760, %v7727_v26  ;;  %v574_v9 = vand.u32 4294901760, %v573_v10 }
  0x43   : > { %6722 = vmatmul.mubr.f32.gmra.mxu0 %v534_v13  ;;  %6761 = vmatprep.mubr.f32.mxu1 %v7670_v46  ;;  %v602_v13 = vand.u32 4294901760, %v7731_v15  ;;  %v612_v18 = vand.u32 4294901760, %v7739_v27 }
  0x44   : > { %6724 = vmatprep.mubr.f32.mxu0 %v544_v37  ;;  %v593_v12 = vsub.f32 %v7727_v26, %v8477_v14  ;;  %v584_v37 = vand.u32 4294901760, %v583_v17 }
  0x45   : > { %v603_v24 = vsub.f32 %v7731_v15, %v602_v13 }
  0x46   : > { %6762 = vmatmul.mubr.f32.gmra.mxu1 %v7687_v1  ;;  %v594_v25 = vand.u32 4294901760, %v593_v12 }
  0x47   : > { %6725 = vmatmul.mubr.f32.gmra.mxu0 %v554_v56  ;;  %6764 = vmatprep.mubr.f32.mxu1 %v7692_v21  ;;  %v613_v56 = vsub.f32 %v7739_v27, %v612_v18  ;;  %v604_v10 = vand.u32 4294901760, %v603_v24 }
  0x48   : > { %6727 = vmatprep.mubr.f32.mxu0 %v564_v55 }
  0x49   : > { %v614_v14 = vand.u32 4294901760, %v613_v56 }
  0x4a   : > { %6765 = vmatmul.mubr.f32.gmra.mxu1 %v7714_v19 }
  0x4b   : > { %6728 = vmatmul.mubr.f32.gmra.mxu0 %v574_v9  ;;  %6767 = vmatprep.mubr.f32.mxu1 %v7722_v5 }
  0x4c   : > { %6730 = vmatprep.mubr.f32.mxu0 %v584_v37 }
  0x4e   : > { %6768 = vmatmul.mubr.f32.gmra.mxu1 %v7724_v20 }
  0x4f   : > { %6731 = vmatmul.mubr.f32.gmra.mxu0 %v594_v25  ;;  %6808 = vmatprep.mubr.f32.mxu1 %v422_v38  ;;  %v8485_v38 = vand.u32 4294901760, %v7655_v8 }
  0x50   : > { %6733 = vmatprep.mubr.f32.mxu0 %v604_v10 }
  0x52   : > { %6809 = vmatmul.mubr.f32.vlgmr.msra.gmra.mxu1 %v432_v39  ;;  %v8486_v39 = vand.u32 4294901760, %v7696_v4 }
  0x53   : > { %6734 = vmatmul.mubr.f32.gmra.mxu0 %v614_v14  ;;  %6811 = vmatprep.mubr.f32.mxu1 %v442_v48 }
  0x54   : > { %6774 = vmatprep.mubr.f32.mxu0 %v7518_v30  ;;  %6873 = vmatpush3.msra.mxu1 %v7450_v2  ;;  %v8479_v2 = vand.u32 4294901760, %v7568_v52  ;;  %v8480_v30 = vand.u32 4294901760, %v7571_v53 }
  0x55   : > { %6874 = vmatprep.subr.mxu1 %v7452_v3 }
  0x56   : > { %6812 = vmatmul.mubr.f32.gmra.mxu1 %v452_v49 }
  0x57   : > { %6775 = vmatmul.mubr.f32.vlgmr.msra.gmra.mxu0 %v7522_v31  ;;  %6814 = vmatprep.mubr.f32.mxu1 %v462_v50  ;;  %v8484_v31 = vand.u32 4294901760, %v7646_v63 }
  0x58   : > { %6777 = vmatprep.mubr.f32.mxu0 %v7539_v40  ;;  %6839 = vmatpush3.msra.mxu0 %v7465_v6  ;;  %v8481_v6 = vand.u32 4294901760, %v7618_v36  ;;  %v8487_v40 = vand.u32 4294901760, %v7701_v60 }
  0x59   : > { %6840 = vmatprep.subr.mxu0 %v7469_v7  ;;  %6875 = vmatpush3.msra.mxu1 %v7452_v3  ;;  %v8482_v3 = vand.u32 4294901760, %v7627_v11 }
  0x5a   : > { %6815 = vmatmul.mubr.f32.gmra.mxu1 %v472_v51  ;;  %6841 = vmatpush3.msra.mxu0 %v7469_v7  ;;  %v8483_v7 = vand.u32 4294901760, %v7643_v62 }
  0x5b   : > { %6778 = vmatmul.mubr.f32.gmra.mxu0 %v7542_v41  ;;  %6817 = vmatprep.mubr.f32.mxu1 %v8479_v2  ;;  %v8488_v41 = vand.u32 4294901760, %v7727_v26 }
  0x5c   : > { %6780 = vmatprep.mubr.f32.mxu0 %v7545_v42 }
  0x5e   : > { %6818 = vmatmul.mubr.f32.gmra.mxu1 %v8480_v30 }
  0x5f   : > { %6781 = vmatmul.mubr.f32.gmra.mxu0 %v7548_v43  ;;  %6820 = vmatprep.mubr.f32.mxu1 %v8481_v6 }
  0x60   : > { %6783 = vmatprep.mubr.f32.mxu0 %v7568_v52 }
  0x62   : > { %6821 = vmatmul.mubr.f32.gmra.mxu1 %v8482_v3 }
  0x63   : > { %6784 = vmatmul.mubr.f32.gmra.mxu0 %v7571_v53  ;;  %6823 = vmatprep.mubr.f32.mxu1 %v8483_v7 }
  0x64   : > { %6786 = vmatprep.mubr.f32.mxu0 %v7618_v36 }
  0x66   : > { %6824 = vmatmul.mubr.f32.gmra.mxu1 %v8484_v31 }
  0x67   : > { %6787 = vmatmul.mubr.f32.gmra.mxu0 %v7627_v11  ;;  %6826 = vmatprep.mubr.f32.mxu1 %v8485_v38 }
  0x68   : > { %6789 = vmatprep.mubr.f32.mxu0 %v7643_v62 }
  0x6a   : > { %6827 = vmatmul.mubr.f32.gmra.mxu1 %v552_v59 }
  0x6b   : > { %6790 = vmatmul.mubr.f32.gmra.mxu0 %v7646_v63  ;;  %6829 = vmatprep.mubr.f32.mxu1 %v562_v61 }
  0x6c   : > { %6792 = vmatprep.mubr.f32.mxu0 %v7655_v8 }
  0x6e   : > { %6830 = vmatmul.mubr.f32.gmra.mxu1 %v8486_v39 }
  0x6f   : > { %6793 = vmatmul.mubr.f32.gmra.mxu0 %v7667_v29  ;;  %6832 = vmatprep.mubr.f32.mxu1 %v8487_v40 }
  0x70   : > { %6795 = vmatprep.mubr.f32.mxu0 %v7685_v58 }
  0x72   : > { %6833 = vmatmul.mubr.f32.gmra.mxu1 %v8488_v41 }
  0x73   : > { %6796 = vmatmul.mubr.f32.gmra.mxu0 %v7696_v4  ;;  %6835 = vmatprep.mubr.f32.mxu1 %v602_v13 }
  0x74   : > { %6798 = vmatprep.mubr.f32.mxu0 %v7701_v60 }
  0x76   : > { %6836 = vmatmul.mubr.f32.gmra.mxu1 %v612_v18 }
  0x77   : > { %6799 = vmatmul.mubr.f32.gmra.mxu0 %v7727_v26  ;;  %6876 = vmatprep.mubr.f32.mxu1 %v7501_v22 }
  0x78   : > { %6801 = vmatprep.mubr.f32.mxu0 %v7731_v15 }
  0x7a   : > { %6877 = vmatmul.mubr.f32.vlgmr.msra.gmra.mxu1 %v7503_v23 }
  0x7b   : > { %6802 = vmatmul.mubr.f32.gmra.mxu0 %v7739_v27  ;;  %6879 = vmatprep.mubr.f32.mxu1 %v7524_v32 }
  0x7c   : > { %6842 = vmatprep.mubr.f32.mxu0 %v7501_v22  ;;  %v7381_v22 = vmov 0.0  }
  0x7d   : > { %6906 = vmatprep.subr.mxu0 %v7381_v22  ;;  %6913 = vmatprep.subr.mxu1 %v7381_v22 }
  0x7e   : > { %6880 = vmatmul.mubr.f32.gmra.mxu1 %v7526_v33 }
  0x7f   : > { %6843 = vmatmul.mubr.f32.vlgmr.msra.gmra.mxu0 %v7503_v23  ;;  %6882 = vmatprep.mubr.f32.mxu1 %v7528_v34 }
  0x80   : > { %6845 = vmatprep.mubr.f32.mxu0 %v7524_v32 }
  0x82   : > { %6883 = vmatmul.mubr.f32.gmra.mxu1 %v7530_v35 }
  0x83   : > { %6846 = vmatmul.mubr.f32.gmra.mxu0 %v7526_v33  ;;  %6885 = vmatprep.mubr.f32.mxu1 %v7550_v44 }
  0x84   : > { %6848 = vmatprep.mubr.f32.mxu0 %v7528_v34 }
  0x86   : > { %6886 = vmatmul.mubr.f32.gmra.mxu1 %v7552_v45 }
  0x87   : > { %6849 = vmatmul.mubr.f32.gmra.mxu0 %v7530_v35  ;;  %6888 = vmatprep.mubr.f32.mxu1 %v7602_v16 }
  0x88   : > { %6851 = vmatprep.mubr.f32.mxu0 %v7550_v44 }
  0x8a   : > { %6889 = vmatmul.mubr.f32.gmra.mxu1 %v7610_v28 }
  0x8b   : > { %6852 = vmatmul.mubr.f32.gmra.mxu0 %v7552_v45  ;;  %6891 = vmatprep.mubr.f32.mxu1 %v7629_v47 }
  0x8c   : > { %6854 = vmatprep.mubr.f32.mxu0 %v7602_v16 }
  0x8e   : > { %6892 = vmatmul.mubr.f32.gmra.mxu1 %v7631_v54 }
  0x8f   : > { %6855 = vmatmul.mubr.f32.gmra.mxu0 %v7610_v28  ;;  %6894 = vmatprep.mubr.f32.mxu1 %v7635_v57 }
  0x90   : > { %6857 = vmatprep.mubr.f32.mxu0 %v7629_v47 }
  0x92   : > { %6895 = vmatmul.mubr.f32.gmra.mxu1 %v7648_v0 }
  0x93   : > { %6858 = vmatmul.mubr.f32.gmra.mxu0 %v7631_v54  ;;  %6897 = vmatprep.mubr.f32.mxu1 %v7670_v46 }
  0x94   : > { %6860 = vmatprep.mubr.f32.mxu0 %v7635_v57 }
  0x96   : > { %6898 = vmatmul.mubr.f32.gmra.mxu1 %v7687_v1 }
  0x97   : > { %6861 = vmatmul.mubr.f32.gmra.mxu0 %v7648_v0  ;;  %6900 = vmatprep.mubr.f32.mxu1 %v7692_v21 }
  0x98   : > { %6863 = vmatprep.mubr.f32.mxu0 %v7670_v46 }
  0x9a   : > { %6901 = vmatmul.mubr.f32.gmra.mxu1 %v7714_v19 }
  0x9b   : > { %6864 = vmatmul.mubr.f32.gmra.mxu0 %v7687_v1  ;;  %6903 = vmatprep.mubr.f32.mxu1 %v7722_v5 }
  0x9c   : > { %6866 = vmatprep.mubr.f32.mxu0 %v7692_v21 }
  0x9e   : > { %6904 = vmatmul.mubr.f32.gmra.mxu1 %v7724_v20 }
  0x9f   : > { %6867 = vmatmul.mubr.f32.gmra.mxu0 %v7714_v19  ;;  %6917 = vmatprep.mubr.msk.f32.mxu1 %vm7382_vm1, %v7381_v22 }
  0xa0   : > { %6869 = vmatprep.mubr.f32.mxu0 %v7722_v5 }
  0xa3   : > { %6870 = vmatmul.mubr.f32.gmra.mxu0 %v7724_v20 }
  0xa4   : > { %6910 = vmatprep.mubr.msk.f32.mxu0 %vm7382_vm1, %v7381_v22 }
  0xea   : > { %v6742_v23 = vpop.f32.mrf.mxu1 }
  0xec   : > { %v7864_v32 = vpop.f32.mrf.mxu1 }
  0xee   : > { %v6745_v33 = vpop.f32.mrf.mxu1 }
  0xef   : > { %v6708_v34 = vpop.f32.mrf.mxu0 }
  0xf0   : > { %v7866_v35 = vadd.f32 %v6742_v23, %v6708_v34  ;;  %v7868_v42 = vpop.f32.mrf.mxu1 }
  0xf1   : > { %v7870_v43 = vpop.f32.mrf.mxu0 }
  0xf2   : > { %v6748_v44 = vpop.f32.mrf.mxu1 }
  0xf3   : > { %v6711_v45 = vpop.f32.mrf.mxu0 }
  0xf4   : > { %v7872_v48 = vadd.f32 %v6745_v33, %v6711_v45  ;;  %v7874_v49 = vpop.f32.mrf.mxu1 }
  0xf5   : > { %v7876_v50 = vpop.f32.mrf.mxu0 }
  0xf6   : > { %v6751_v51 = vpop.f32.mrf.mxu1 }
  0xf7   : > { %v6714_v52 = vpop.f32.mrf.mxu0 }
  0xf8   : > { %v7878_v53 = vadd.f32 %v6748_v44, %v6714_v52  ;;  %v733_v60 = vpop.f32.mrf.mxu1 }
  0xf9   : > { %v7880_v61 = vpop.f32.mrf.mxu0 }
  0xfa   : > { %v6754_v16 = vpop.f32.mrf.mxu1 }
  0xfb   : > { %v6717_v28 = vpop.f32.mrf.mxu0 }
  0xfc   : > { %v740_v36 = vadd.f32 %v6751_v51, %v6717_v28  ;;  %v745_v11 = vpop.f32.mrf.mxu1 }
  0xfd   : > { %v486_v47 = vpop.f32.mrf.mxu0 }
  0xfe   : > { %v6757_v54 = vpop.f32.mrf.mxu1 }
  0xff   : > { %v6720_v57 = vpop.f32.mrf.mxu0 }
 0x100   : > { %v752_v59 = vadd.f32 %v6754_v16, %v6720_v57  ;;  %v757_v62 = vpop.f32.mrf.mxu1 }
 0x101   : > { %v506_v63 = vpop.f32.mrf.mxu0 }
 0x102   : > { %v746_v0 = vadd.f32 %v745_v11, %v506_v63  ;;  %v6760_v8 = vpop.f32.mrf.mxu1  ;;  %v734_v11 = vadd.f32 %v733_v60, %v486_v47 }
 0x103   : > { %v6723_v21 = vpop.f32.mrf.mxu0 }
 0x104   : > { %v764_v29 = vadd.f32 %v6757_v54, %v6723_v21  ;;  %v769_v4 = vpop.f32.mrf.mxu1 }
 0x105   : > { %v526_v46 = vpop.f32.mrf.mxu0 }
 0x106   : > { %v758_v58 = vadd.f32 %v757_v62, %v526_v46  ;;  %v6763_v1 = vpop.f32.mrf.mxu1 }
 0x107   : > { %v6726_v12 = vpop.f32.mrf.mxu0 }
 0x108   : > { %v776_v19 = vadd.f32 %v6760_v8, %v6726_v12  ;;  %v781_v25 = vpop.f32.mrf.mxu1 }
 0x109   : > { %v546_v5 = vpop.f32.mrf.mxu0 }
 0x10a   : > { %v7882_v20 = vadd.f32 %v769_v4, %v546_v5  ;;  %v6766_v26 = vpop.f32.mrf.mxu1 }
 0x10b   : > { %v6729_v15 = vpop.f32.mrf.mxu0 }
 0x10c   : > { %v7884_v14 = vadd.f32 %v6763_v1, %v6729_v15  ;;  %v793_v27 = vpop.f32.mrf.mxu1 }
 0x10d   : > { %v566_v55 = vpop.f32.mrf.mxu0 }
 0x10e   : > { %v7886_v17 = vadd.f32 %v781_v25, %v566_v55  ;;  %v6769_v13 = vpop.f32.mrf.mxu1 }
 0x10f   : > { %v6732_v9 = vpop.f32.mrf.mxu0 }
 0x110   : > { %v7888_v18 = vadd.f32 %v6766_v26, %v6732_v9  ;;  %v805_v37 = vpop.f32.mrf.mxu1 }
 0x111   : > { %v586_v24 = vpop.f32.mrf.mxu0 }
 0x112   : > { %v7890_v56 = vadd.f32 %v793_v27, %v586_v24  ;;  %v7892_v10 = vpop.f32.mrf.mxu1 }
 0x113   : > { %v6735_v2 = vpop.f32.mrf.mxu0 }
 0x114   : > { %v7894_v30 = vadd.f32 %v6769_v13, %v6735_v2  ;;  %v7896_v6 = vpop.f32.mrf.mxu1 }
 0x115   : > { %v606_v3 = vpop.f32.mrf.mxu0 }
 0x116   : > { %v7898_v7 = vadd.f32 %v805_v37, %v606_v3  ;;  %v7900_v31 = vpop.f32.mrf.mxu1 }
 0x117   : > { %v6776_v38 = vpop.f32.mrf.mxu0 }
 0x118   : > { %v7902_v39 = vpop.f32.mrf.mxu1 }
 0x119   : > { %v7904_v40 = vpop.f32.mrf.mxu0 }
 0x11a   : > { %v7906_v41 = vpop.f32.mrf.mxu1 }
 0x11b   : > { %v7908_v23 = vpop.f32.mrf.mxu0 }
 0x11c   : > { %v7910_v33 = vpop.f32.mrf.mxu1 }
 0x11d   : > { %v7912_v34 = vpop.f32.mrf.mxu0 }
 0x11e   : > { %v6819_v44 = vpop.f32.mrf.mxu1 }
 0x11f   : > { %v7914_v45 = vpop.f32.mrf.mxu0 }
 0x120   : > { %v1143_v51 = vpop.f32.mrf.mxu1 }
 0x121   : > { %v7916_v52 = vpop.f32.mrf.mxu0 }
 0x122   : > { %v6822_v16 = vpop.f32.mrf.mxu1 }
 0x123   : > { %v6785_v28 = vpop.f32.mrf.mxu0 }
 0x124   : > { %v937_v54 = vadd.f32 %v6785_v28, %v740_v36  ;;  %v1159_v57 = vpop.f32.mrf.mxu1 }
 0x125   : > { %v929_v62 = vpop.f32.mrf.mxu0 }
 0x126   : > { %v7918_v63 = vadd.f32 %v6819_v44, %v937_v54  ;;  %v930_v8 = vadd.f32 %v929_v62, %v734_v11  ;;  %v6825_v21 = vpop.f32.mrf.mxu1 }
 0x127   : > { %v6788_v4 = vpop.f32.mrf.mxu0 }
 0x128   : > { %v7920_v46 = vadd.f32 %v1143_v51, %v930_v8  ;;  %v951_v1 = vadd.f32 %v6788_v4, %v752_v59  ;;  %v1175_v12 = vpop.f32.mrf.mxu1  ;;  %v271_v59 = vld [vmem:[%s8464_s2] sm:$0x3f] }
 0x129   : > { %v943_v25 = vpop.f32.mrf.mxu0  ;;  %v1630_v28 = vsel %vm292_vm0, %v271_v59, 0 }
 0x12a   : > { %v7922_v5 = vadd.f32 %v6822_v16, %v951_v1  ;;  %v944_v26 = vadd.f32 %v943_v25, %v746_v0  ;;  %v6828_v15 = vpop.f32.mrf.mxu1  ;;  %v7940_v8 = vand.u32 4294901760, %v1630_v28 }
 0x12b   : > { %v6791_v27 = vpop.f32.mrf.mxu0 }
 0x12c   : > { %v7924_v55 = vadd.f32 %v1159_v57, %v944_v26  ;;  %v965_v60 = vadd.f32 %v6791_v27, %v764_v29  ;;  %v1191_v36 = vpop.f32.mrf.mxu1  ;;  %v7949_v26 = vsub.f32 %v1630_v28, %v7940_v8 }
 0x12d   : > { %v957_v47 = vpop.f32.mrf.mxu0 }
 0x12e   : > { %v7926_v13 = vadd.f32 %v6825_v21, %v965_v60  ;;  %v958_v9 = vadd.f32 %v957_v47, %v758_v58  ;;  %v6831_v37 = vpop.f32.mrf.mxu1 }
 0x12f   : > { %v6794_v24 = vpop.f32.mrf.mxu0 }
 0x130   : > { %v7931_v2 = vadd.f32 %v1175_v12, %v958_v9  ;;  %v979_v3 = vadd.f32 %v6794_v24, %v776_v19  ;;  %v1207_v0 = vpop.f32.mrf.mxu1  ;;  %v7962_v24 = vand.u32 4294901760, %v7949_v26 }
 0x131   : > { %v971_v44 = vpop.f32.mrf.mxu0 }
 0x132   : > { %v7933_v51 = vadd.f32 %v6828_v15, %v979_v3  ;;  %v972_v29 = vadd.f32 %v971_v44, %v7882_v20  ;;  %v6834_v16 = vpop.f32.mrf.mxu1  ;;  %v895_v15 = vadd.f32 %v6776_v38, %v7866_v35 }
 0x133   : > { %v6797_v11 = vpop.f32.mrf.mxu0 }
 0x134   : > { %v7937_v58 = vadd.f32 %v1191_v36, %v972_v29  ;;  %v993_v54 = vadd.f32 %v6797_v11, %v7884_v14  ;;  %v1223_v57 = vpop.f32.mrf.mxu1  ;;  %v698_v14 = vadd.f32 %v7864_v32, %v7870_v43  ;;  %v1104_v32 = vadd.f32 %v7892_v10, %v895_v15 }
 0x135   : > { %v985_v62 = vpop.f32.mrf.mxu0  ;;  %v1702_v29 = vsub.f32 %v7949_v26, %v7962_v24 }
 0x136   : > { %v7942_v21 = vadd.f32 %v6831_v37, %v993_v54  ;;  %v986_v19 = vadd.f32 %v985_v62, %v7886_v17  ;;  %v6837_v4 = vpop.f32.mrf.mxu1  ;;  %v888_v47 = vadd.f32 %v7904_v40, %v698_v14  ;;  %v909_v40 = vadd.f32 %v7908_v23, %v7872_v48 }
 0x137   : > { %v6800_v1 = vpop.f32.mrf.mxu0  ;;  %v7982_v62 = vand.u32 4294901760, %v1702_v29 }
 0x138   : > { %v7945_v12 = vadd.f32 %v1207_v0, %v986_v19  ;;  %v1007_v20 = vadd.f32 %v6800_v1, %v7888_v18  ;;  %v1239_v17 = vpop.f32.mrf.mxu1 }
 0x139   : > { %v999_v25 = vpop.f32.mrf.mxu0 }
 0x13a   : > { %v7954_v27 = vadd.f32 %v6834_v16, %v1007_v20  ;;  %v1000_v60 = vadd.f32 %v999_v25, %v7890_v56  ;;  %v6878_v38 = vpop.f32.mrf.mxu1  ;;  %v710_v56 = vadd.f32 %v7868_v42, %v7876_v50  ;;  %v1120_v42 = vadd.f32 %v7900_v31, %v909_v40 }
 0x13b   : > { %v6803_v36 = vpop.f32.mrf.mxu0 }
 0x13c   : > { %v7958_v9 = vadd.f32 %v1223_v57, %v1000_v60  ;;  %v1021_v18 = vadd.f32 %v6803_v36, %v7894_v30  ;;  %v1096_v30 = vadd.f32 %v7896_v6, %v888_v47  ;;  %v902_v44 = vadd.f32 %v7912_v34, %v710_v56  ;;  %v1511_v28 = vpop.f32.mrf.mxu1 }
 0x13d   : > { %v1013_v37 = vpop.f32.mrf.mxu0 }
 0x13e   : > { %v7965_v43 = vadd.f32 %v6837_v4, %v1021_v18  ;;  %v1014_v35 = vadd.f32 %v1013_v37, %v7898_v7  ;;  %v6881_v23 = vpop.f32.mrf.mxu1  ;;  %v1112_v6 = vadd.f32 %v7902_v39, %v902_v44  ;;  %v722_v37 = vadd.f32 %v7874_v49, %v7880_v61 }
 0x13f   : > { %v6844_v59 = vpop.f32.mrf.mxu0 }
 0x140   : > { %v7973_v3 = vadd.f32 %v1239_v17, %v1014_v35  ;;  %v1331_v0 = vadd.f32 %v6844_v59, %v1104_v32  ;;  %v1523_v20 = vpop.f32.mrf.mxu1  ;;  %v923_v32 = vadd.f32 %v7914_v45, %v7878_v53  ;;  %v916_v56 = vadd.f32 %v7916_v52, %v722_v37 }
 0x141   : > { %v1324_v10 = vpop.f32.mrf.mxu0 }
 0x142   : > { %v1518_v7 = vadd.f32 %v6878_v38, %v1331_v0  ;;  %v1325_v16 = vadd.f32 %v1324_v10, %v1096_v30  ;;  %v1136_v49 = vadd.f32 %v7906_v41, %v923_v32  ;;  %v6884_v45 = vpop.f32.mrf.mxu1  ;;  %v1128_v52 = vadd.f32 %v7910_v33, %v916_v56 }
 0x143   : > { %v6847_v50 = vpop.f32.mrf.mxu0 }
 0x144   : > { %v7979_v11 = vand.u32 4294901760, %v1518_v7  ;;  %v1512_v48 = vadd.f32 %v1511_v28, %v1325_v16  ;;  %v1343_v54 = vadd.f32 %v6847_v50, %v1120_v42  ;;  %v1535_v44 = vpop.f32.mrf.mxu1 }
 0x145   : > { %v1336_v57 = vpop.f32.mrf.mxu0 }
 0x146   : > { %v1739_v34 = vsub.f32 %v1518_v7, %v7979_v11  ;;  %v7985_v19 = vand.u32 4294901760, %v1512_v48  ;;  %6907 = vmatpush3.msra.mxu0 %v7979_v11  ;;  %v1337_v4 = vadd.f32 %v1336_v57, %v1112_v6  ;;  %v1530_v39 = vadd.f32 %v6881_v23, %v1343_v54  ;;  %v6887_v54 = vpop.f32.mrf.mxu1 }
 0x147   : > { %6908 = vmatprep.subr.mxu0 %v7381_v22  ;;  %v6850_v38 = vpop.f32.mrf.mxu0 }
 0x148   : > { %v1740_v31 = vand.u32 4294901760, %v1739_v34  ;;  %v1746_v1 = vsub.f32 %v1512_v48, %v7985_v19  ;;  %6909 = vmatpush3.msra.mxu0 %v7985_v19  ;;  %v1524_v15 = vadd.f32 %v1523_v20, %v1337_v4  ;;  %v7996_v17 = vand.u32 4294901760, %v1530_v39 }
 0x149   : > { %6920 = vmatprep.subr.mxu0 %v7381_v22  ;;  %6911 = vmatmul.mubr.f32.vlgmr.msra.gmra.mxu0 %v7982_v62  ;;  %v1348_v61 = vpop.f32.mrf.mxu0  ;;  %v1355_v59 = vadd.f32 %v6850_v38, %v1136_v49 }
 0x14a   : > { %v1741_v25 = vsub.f32 %v1739_v34, %v1740_v31  ;;  %v1747_v14 = vand.u32 4294901760, %v1746_v1  ;;  %6921 = vmatpush3.msra.mxu0 %v1739_v34  ;;  %6924 = vmatprep.mubr.msk.f32.mxu0 %vm7382_vm1, %v7381_v22  ;;  %v8002_v47 = vand.u32 4294901760, %v1524_v15  ;;  %v2198_v35 = vsub.f32 %v1530_v39, %v7996_v17 }
 0x14b   : > { %6922 = vmatprep.subr.mxu0 %v7381_v22  ;;  %v1349_v0 = vadd.f32 %v1348_v61, %v1128_v52  ;;  %v1542_v10 = vadd.f32 %v6884_v45, %v1355_v59 }
 0x14c   : > { %v1748_v60 = vsub.f32 %v1746_v1, %v1747_v14  ;;  %6923 = vmatpush3.msra.mxu0 %v1746_v1  ;;  %v1742_v36 = vand.u32 4294901760, %v1741_v25  ;;  %v2205_v40 = vsub.f32 %v1524_v15, %v8002_v47  ;;  %v2199_v53 = vand.u32 4294901760, %v2198_v35 }
 0x14d   : > { %6934 = vmatprep.subr.mxu0 %v7381_v22  ;;  %6925 = vmatmul.mubr.f32.vlgmr.msra.gmra.mxu0 %v7949_v26  ;;  %v1536_v29 = vadd.f32 %v1535_v44, %v1349_v0  ;;  %v8044_v16 = vand.u32 4294901760, %v1542_v10 }
 0x14e   : > { %6935 = vmatpush3.msra.mxu0 %v1740_v31  ;;  %6938 = vmatprep.mubr.msk.f32.mxu0 %vm7382_vm1, %v7381_v22  ;;  %v1749_v18 = vand.u32 4294901760, %v1748_v60  ;;  %v2206_v30 = vand.u32 4294901760, %v2205_v40  ;;  %v2200_v41 = vsub.f32 %v2198_v35, %v2199_v53  ;;  %v1547_v31 = vpop.f32.mrf.mxu1 }
 0x14f   : > { %6914 = vmatpush3.msra.mxu1 %v1742_v36  ;;  %6936 = vmatprep.subr.mxu0 %v7381_v22  ;;  %v8048_v42 = vand.u32 4294901760, %v1536_v29  ;;  %v2657_v50 = vsub.f32 %v1542_v10, %v8044_v16 }
 0x150   : > { %6915 = vmatprep.subr.mxu1 %v7381_v22  ;;  %6937 = vmatpush3.msra.mxu0 %v1747_v14  ;;  %v2207_v33 = vsub.f32 %v2205_v40, %v2206_v30  ;;  %v2201_v7 = vand.u32 4294901760, %v2200_v41 }
 0x151   : > { %6916 = vmatpush3.msra.mxu1 %v1749_v18  ;;  %6948 = vmatprep.subr.mxu0 %v7381_v22  ;;  %v2664_v48 = vsub.f32 %v1536_v29, %v8048_v42  ;;  %v2658_v23 = vand.u32 4294901760, %v2657_v50  ;;  %v6890_v18 = vpop.f32.mrf.mxu1 }
 0x152   : > { %6918 = vmatmul.mubr.f32.vlgmr.msra.gmra.mxu1 %v7940_v8  ;;  %6927 = vmatprep.subr.mxu1 %v7381_v22  ;;  %v2208_v28 = vand.u32 4294901760, %v2207_v33 }
 0x153   : > { %6928 = vmatpush3.msra.mxu1 %v7979_v11  ;;  %6939 = vmatmul.mubr.f32.vlgmr.msra.gmra.mxu0 %v7940_v8  ;;  %v2665_v34 = vand.u32 4294901760, %v2664_v48  ;;  %v1559_v56 = vpop.f32.mrf.mxu1 }
 0x154   : > { %6949 = vmatpush3.msra.mxu0 %v7996_v17  ;;  %6929 = vmatprep.subr.mxu1 %v7381_v22 }
 0x155   : > { %6950 = vmatprep.subr.mxu0 %v7381_v22  ;;  %6930 = vmatpush3.msra.mxu1 %v7985_v19  ;;  %v6893_v44 = vpop.f32.mrf.mxu1 }
 0x156   : > { %6931 = vmatprep.mubr.msk.f32.mxu1 %vm7382_vm1, %v7381_v22  ;;  %6951 = vmatpush3.msra.mxu0 %v8002_v47 }
 0x157   : > { %6932 = vmatmul.mubr.f32.vlgmr.msra.gmra.mxu1 %v7962_v24  ;;  %6941 = vmatprep.subr.mxu1 %v7381_v22 }
 0x158   : > { %6952 = vmatprep.mubr.msk.f32.mxu0 %vm7382_vm1, %v7381_v22  ;;  %6962 = vmatprep.subr.mxu0 %v7381_v22 }
 0x159   : > { %6942 = vmatpush3.msra.mxu1 %v7979_v11  ;;  %6953 = vmatmul.mubr.f32.vlgmr.msra.gmra.mxu0 %v7982_v62  ;;  %v6853_v11 = vpop.f32.mrf.mxu0 }
 0x15a   : > { %6963 = vmatpush3.msra.mxu0 %v2198_v35  ;;  %6943 = vmatprep.subr.mxu1 %v7381_v22  ;;  %v1367_v57 = vadd.f32 %v6853_v11, %v7918_v63  ;;  %v2666_v63 = vsub.f32 %v2664_v48, %v2665_v34 }
 0x15b   : > { %6964 = vmatprep.subr.mxu0 %v7381_v22  ;;  %6944 = vmatpush3.msra.mxu1 %v7985_v19  ;;  %v1360_v6 = vpop.f32.mrf.mxu0  ;;  %v2659_v19 = vsub.f32 %v2657_v50, %v2658_v23 }
 0x15c   : > { %6945 = vmatprep.mubr.msk.f32.mxu1 %vm7382_vm1, %v7381_v22  ;;  %6965 = vmatpush3.msra.mxu0 %v2205_v40  ;;  %v1361_v4 = vadd.f32 %v1360_v6, %v7920_v46  ;;  %v1554_v1 = vadd.f32 %v6887_v54, %v1367_v57  ;;  %v2667_v25 = vand.u32 4294901760, %v2666_v63 }
 0x15d   : > { %6946 = vmatmul.mubr.f32.vlgmr.msra.gmra.mxu1 %v7940_v8  ;;  %6955 = vmatprep.subr.mxu1 %v7381_v22  ;;  %v2660_v46 = vand.u32 4294901760, %v2659_v19  ;;  %v6856_v60 = vpop.f32.mrf.mxu0 }
 0x15e   : > { %6966 = vmatprep.mubr.msk.f32.mxu0 %vm7382_vm1, %v7381_v22  ;;  %6976 = vmatprep.subr.mxu0 %v7381_v22  ;;  %v1548_v20 = vadd.f32 %v1547_v31, %v1361_v4  ;;  %v8088_v39 = vand.u32 4294901760, %v1554_v1  ;;  %v1379_v37 = vadd.f32 %v6856_v60, %v7922_v5 }
 0x15f   : > { %6956 = vmatpush3.msra.mxu1 %v2201_v7  ;;  %6967 = vmatmul.mubr.f32.vlgmr.msra.gmra.mxu0 %v7949_v26 }
 0x160   : > { %6977 = vmatpush3.msra.mxu0 %v2199_v53  ;;  %6957 = vmatprep.subr.mxu1 %v7381_v22  ;;  %v8092_v14 = vand.u32 4294901760, %v1548_v20  ;;  %v3116_v15 = vsub.f32 %v1554_v1, %v8088_v39  ;;  %v1566_v40 = vadd.f32 %v6890_v18, %v1379_v37 }
 0x161   : > { %6978 = vmatprep.subr.mxu0 %v7381_v22  ;;  %6958 = vmatpush3.msra.mxu1 %v2208_v28 }
 0x162   : > { %6959 = vmatprep.mubr.msk.f32.mxu1 %vm7382_vm1, %v7381_v22  ;;  %6979 = vmatpush3.msra.mxu0 %v2206_v30  ;;  %v3117_v36 = vand.u32 4294901760, %v3116_v15  ;;  %v8132_v53 = vand.u32 4294901760, %v1566_v40 }
 0x163   : > { %6960 = vmatmul.mubr.f32.vlgmr.msra.gmra.mxu1 %v7940_v8  ;;  %6969 = vmatprep.subr.mxu1 %v7381_v22 }
 0x164   : > { %6980 = vmatprep.mubr.msk.f32.mxu0 %vm7382_vm1, %v7381_v22  ;;  %6990 = vmatprep.subr.mxu0 %v7381_v22  ;;  %v3118_v35 = vsub.f32 %v3116_v15, %v3117_v36  ;;  %v3575_v52 = vsub.f32 %v1566_v40, %v8132_v53 }
 0x165   : > { %6970 = vmatpush3.msra.mxu1 %v7996_v17  ;;  %6981 = vmatmul.mubr.f32.vlgmr.msra.gmra.mxu0 %v7940_v8 }
 0x166   : > { %6991 = vmatpush3.msra.mxu0 %v8044_v16  ;;  %6971 = vmatprep.subr.mxu1 %v7381_v22  ;;  %v3576_v41 = vand.u32 4294901760, %v3575_v52 }
 0x167   : > { %6992 = vmatprep.subr.mxu0 %v7381_v22  ;;  %6972 = vmatpush3.msra.mxu1 %v8002_v47 }
 0x168   : > { %6973 = vmatprep.mubr.msk.f32.mxu1 %vm7382_vm1, %v7381_v22  ;;  %6993 = vmatpush3.msra.mxu0 %v8048_v42  ;;  %v3577_v29 = vsub.f32 %v3575_v52, %v3576_v41 }
 0x169   : > { %6974 = vmatmul.mubr.f32.vlgmr.msra.gmra.mxu1 %v7962_v24  ;;  %6983 = vmatprep.subr.mxu1 %v7381_v22 }
 0x16a   : > { %6994 = vmatprep.mubr.msk.f32.mxu0 %vm7382_vm1, %v7381_v22  ;;  %7004 = vmatprep.subr.mxu0 %v7381_v22 }
 0x16b   : > { %6984 = vmatpush3.msra.mxu1 %v7996_v17  ;;  %6995 = vmatmul.mubr.f32.vlgmr.msra.gmra.mxu0 %v7982_v62  ;;  %v3123_v17 = vsub.f32 %v1548_v20, %v8092_v14 }
 0x16c   : > { %7005 = vmatpush3.msra.mxu0 %v2657_v50  ;;  %6985 = vmatprep.subr.mxu1 %v7381_v22 }
 0x16d   : > { %7006 = vmatprep.subr.mxu0 %v7381_v22  ;;  %6986 = vmatpush3.msra.mxu1 %v8002_v47  ;;  %v1372_v47 = vpop.f32.mrf.mxu0  ;;  %v3124_v32 = vand.u32 4294901760, %v3123_v17 }
 0x16e   : > { %6987 = vmatprep.mubr.msk.f32.mxu1 %vm7382_vm1, %v7381_v22  ;;  %7007 = vmatpush3.msra.mxu0 %v2664_v48  ;;  %v1373_v38 = vadd.f32 %v1372_v47, %v7924_v55  ;;  %v3119_v55 = vand.u32 4294901760, %v3118_v35 }
 0x16f   : > { %6988 = vmatmul.mubr.f32.vlgmr.msra.gmra.mxu1 %v7940_v8  ;;  %6997 = vmatprep.subr.mxu1 %v7381_v22  ;;  %v3125_v5 = vsub.f32 %v3123_v17, %v3124_v32  ;;  %v6859_v59 = vpop.f32.mrf.mxu0 }
 0x170   : > { %7008 = vmatprep.mubr.msk.f32.mxu0 %vm7382_vm1, %v7381_v22  ;;  %7018 = vmatprep.subr.mxu0 %v7381_v22  ;;  %v1560_v49 = vadd.f32 %v1559_v56, %v1373_v38  ;;  %v1391_v33 = vadd.f32 %v6859_v59, %v7926_v13 }
 0x171   : > { %6998 = vmatpush3.msra.mxu1 %v2660_v46  ;;  %7009 = vmatmul.mubr.f32.vlgmr.msra.gmra.mxu0 %v7949_v26  ;;  %v3126_v61 = vand.u32 4294901760, %v3125_v5  ;;  %v1384_v0 = vpop.f32.mrf.mxu0 }
 0x172   : > { %7019 = vmatpush3.msra.mxu0 %v2658_v23  ;;  %6999 = vmatprep.subr.mxu1 %v7381_v22  ;;  %v8136_v45 = vand.u32 4294901760, %v1560_v49  ;;  %v1385_v7 = vadd.f32 %v1384_v0, %v7931_v2  ;;  %v1578_v28 = vadd.f32 %v6893_v44, %v1391_v33  ;;  %v3578_v2 = vand.u32 4294901760, %v3577_v29 }
 0x173   : > { %7020 = vmatprep.subr.mxu0 %v7381_v22  ;;  %7000 = vmatpush3.msra.mxu1 %v2667_v25  ;;  %v6862_v6 = vpop.f32.mrf.mxu0 }
 0x174   : > { %7001 = vmatprep.mubr.msk.f32.mxu1 %vm7382_vm1, %v7381_v22  ;;  %7021 = vmatpush3.msra.mxu0 %v2665_v34  ;;  %v3582_v30 = vsub.f32 %v1560_v49, %v8136_v45  ;;  %v8176_v50 = vand.u32 4294901760, %v1578_v28  ;;  %v1403_v4 = vadd.f32 %v6862_v6, %v7933_v51 }
 0x175   : > { %7002 = vmatmul.mubr.f32.vlgmr.msra.gmra.mxu1 %v7940_v8  ;;  %7011 = vmatprep.subr.mxu1 %v7381_v22  ;;  %v1396_v34 = vpop.f32.mrf.mxu0 }
 0x176   : > { %7022 = vmatprep.mubr.msk.f32.mxu0 %vm7382_vm1, %v7381_v22  ;;  %7032 = vmatprep.subr.mxu0 %v7381_v22  ;;  %v3583_v10 = vand.u32 4294901760, %v3582_v30  ;;  %v4034_v23 = vsub.f32 %v1578_v28, %v8176_v50  ;;  %v1397_v1 = vadd.f32 %v1396_v34, %v7937_v58 }
 0x177   : > { %7012 = vmatpush3.msra.mxu1 %v8044_v16  ;;  %7023 = vmatmul.mubr.f32.vlgmr.msra.gmra.mxu0 %v7940_v8 }
 0x178   : > { %7033 = vmatpush3.msra.mxu0 %v8088_v39  ;;  %7013 = vmatprep.subr.mxu1 %v7381_v22  ;;  %v3584_v13 = vsub.f32 %v3582_v30, %v3583_v10  ;;  %v4035_v57 = vand.u32 4294901760, %v4034_v23 }
 0x179   : > { %7034 = vmatprep.subr.mxu0 %v7381_v22  ;;  %7014 = vmatpush3.msra.mxu1 %v8048_v42 }
 0x17a   : > { %7015 = vmatprep.mubr.msk.f32.mxu1 %vm7382_vm1, %v7381_v22  ;;  %7035 = vmatpush3.msra.mxu0 %v8092_v14  ;;  %v3585_v11 = vand.u32 4294901760, %v3584_v13  ;;  %v4036_v63 = vsub.f32 %v4034_v23, %v4035_v57 }
 0x17b   : > { %7016 = vmatmul.mubr.f32.vlgmr.msra.gmra.mxu1 %v7962_v24  ;;  %7025 = vmatprep.subr.mxu1 %v7381_v22 }
 0x17c   : > { %7036 = vmatprep.mubr.msk.f32.mxu0 %vm7382_vm1, %v7381_v22  ;;  %7046 = vmatprep.subr.mxu0 %v7381_v22  ;;  %v4037_v58 = vand.u32 4294901760, %v4036_v63 }
 0x17d   : > { %7026 = vmatpush3.msra.mxu1 %v8044_v16  ;;  %7037 = vmatmul.mubr.f32.vlgmr.msra.gmra.mxu0 %v7982_v62  ;;  %v1571_v16 = vpop.f32.mrf.mxu1 }
 0x17e   : > { %7047 = vmatpush3.msra.mxu0 %v3116_v15  ;;  %7027 = vmatprep.subr.mxu1 %v7381_v22 }
 0x17f   : > { %7048 = vmatprep.subr.mxu0 %v7381_v22  ;;  %7028 = vmatpush3.msra.mxu1 %v8048_v42  ;;  %v1572_v42 = vadd.f32 %v1571_v16, %v1385_v7  ;;  %v6896_v19 = vpop.f32.mrf.mxu1 }
 0x180   : > { %7029 = vmatprep.mubr.msk.f32.mxu1 %vm7382_vm1, %v7381_v22  ;;  %7049 = vmatpush3.msra.mxu0 %v3123_v17  ;;  %v1590_v46 = vadd.f32 %v6896_v19, %v1403_v4  ;;  %v6865_v17 = vpop.f32.mrf.mxu0 }
 0x181   : > { %7030 = vmatmul.mubr.f32.vlgmr.msra.gmra.mxu1 %v7940_v8  ;;  %7039 = vmatprep.subr.mxu1 %v7381_v22  ;;  %v8180_v48 = vand.u32 4294901760, %v1572_v42  ;;  %v1583_v20 = vpop.f32.mrf.mxu1 }
 0x182   : > { %7050 = vmatprep.mubr.msk.f32.mxu0 %vm7382_vm1, %v7381_v22  ;;  %7060 = vmatprep.subr.mxu0 %v7381_v22  ;;  %v8220_v25 = vand.u32 4294901760, %v1590_v46  ;;  %v1408_v18 = vpop.f32.mrf.mxu0 }
 0x183   : > { %7040 = vmatpush3.msra.mxu1 %v3119_v55  ;;  %7051 = vmatmul.mubr.f32.vlgmr.msra.gmra.mxu0 %v7949_v26  ;;  %v4041_v54 = vsub.f32 %v1572_v42, %v8180_v48  ;;  %v6899_v37 = vpop.f32.mrf.mxu1  ;;  %v1409_v56 = vadd.f32 %v1408_v18, %v7945_v12 }
 0x184   : > { %7061 = vmatpush3.msra.mxu0 %v3117_v36  ;;  %7041 = vmatprep.subr.mxu1 %v7381_v22  ;;  %v4493_v60 = vsub.f32 %v1590_v46, %v8220_v25 }
 0x185   : > { %7062 = vmatprep.subr.mxu0 %v7381_v22  ;;  %7042 = vmatpush3.msra.mxu1 %v3126_v61  ;;  %v4042_v31 = vand.u32 4294901760, %v4041_v54  ;;  %v1595_v5 = vpop.f32.mrf.mxu1 }
 0x186   : > { %7043 = vmatprep.mubr.msk.f32.mxu1 %vm7382_vm1, %v7381_v22  ;;  %7063 = vmatpush3.msra.mxu0 %v3124_v32  ;;  %v4494_v47 = vand.u32 4294901760, %v4493_v60  ;;  %v1415_v32 = vadd.f32 %v6865_v17, %v7942_v21  ;;  %v1596_v49 = vadd.f32 %v1595_v5, %v1409_v56 }
 0x187   : > { %7044 = vmatmul.mubr.f32.vlgmr.msra.gmra.mxu1 %v7940_v8  ;;  %7053 = vmatprep.subr.mxu1 %v7381_v22  ;;  %v4043_v51 = vsub.f32 %v4041_v54, %v4042_v31  ;;  %v6902_v0 = vpop.f32.mrf.mxu1 }
 0x188   : > { %7064 = vmatprep.mubr.msk.f32.mxu0 %vm7382_vm1, %v7381_v22  ;;  %7074 = vmatprep.subr.mxu0 %v7381_v22  ;;  %v4495_v38 = vsub.f32 %v4493_v60, %v4494_v47  ;;  %v1602_v40 = vadd.f32 %v6899_v37, %v1415_v32  ;;  %v8268_v61 = vand.u32 4294901760, %v1596_v49 }
 0x189   : > { %7054 = vmatpush3.msra.mxu1 %v8088_v39  ;;  %7065 = vmatmul.mubr.f32.vlgmr.msra.gmra.mxu0 %v7940_v8  ;;  %v1607_v7 = vpop.f32.mrf.mxu1 }
 0x18a   : > { %7075 = vmatpush3.msra.mxu0 %v8132_v53  ;;  %7055 = vmatprep.subr.mxu1 %v7381_v22  ;;  %v4496_v12 = vand.u32 4294901760, %v4495_v38  ;;  %v8264_v55 = vand.u32 4294901760, %v1602_v40  ;;  %v4959_v59 = vsub.f32 %v1596_v49, %v8268_v61 }
 0x18b   : > { %7076 = vmatprep.subr.mxu0 %v7381_v22  ;;  %7056 = vmatpush3.msra.mxu1 %v8092_v14 }
 0x18c   : > { %7057 = vmatprep.mubr.msk.f32.mxu1 %vm7382_vm1, %v7381_v22  ;;  %7077 = vmatpush3.msra.mxu0 %v8136_v45  ;;  %v4960_v33 = vand.u32 4294901760, %v4959_v59 }
 0x18d   : > { %7058 = vmatmul.mubr.f32.vlgmr.msra.gmra.mxu1 %v7962_v24  ;;  %7067 = vmatprep.subr.mxu1 %v7381_v22 }
 0x18e   : > { %7078 = vmatprep.mubr.msk.f32.mxu0 %vm7382_vm1, %v7381_v22  ;;  %7088 = vmatprep.subr.mxu0 %v7381_v22 }
 0x18f   : > { %7068 = vmatpush3.msra.mxu1 %v8088_v39  ;;  %7079 = vmatmul.mubr.f32.vlgmr.msra.gmra.mxu0 %v7982_v62  ;;  %v1584_v39 = vadd.f32 %v1583_v20, %v1397_v1 }
 0x190   : > { %7089 = vmatpush3.msra.mxu0 %v3575_v52  ;;  %7069 = vmatprep.subr.mxu1 %v7381_v22  ;;  %v6868_v52 = vpop.f32.mrf.mxu0 }
 0x191   : > { %7090 = vmatprep.subr.mxu0 %v7381_v22  ;;  %7070 = vmatpush3.msra.mxu1 %v8092_v14  ;;  %v4044_v14 = vand.u32 4294901760, %v4043_v51  ;;  %v8224_v15 = vand.u32 4294901760, %v1584_v39  ;;  %v1427_v44 = vadd.f32 %v6868_v52, %v7954_v27  ;;  %v4961_v27 = vsub.f32 %v4959_v59, %v4960_v33 }
 0x192   : > { %7071 = vmatprep.mubr.msk.f32.mxu1 %vm7382_vm1, %v7381_v22  ;;  %7091 = vmatpush3.msra.mxu0 %v3582_v30 }
 0x193   : > { %7072 = vmatmul.mubr.f32.vlgmr.msra.gmra.mxu1 %v7940_v8  ;;  %7081 = vmatprep.subr.mxu1 %v7381_v22  ;;  %v4500_v36 = vsub.f32 %v1584_v39, %v8224_v15  ;;  %v1614_v16 = vadd.f32 %v6902_v0, %v1427_v44  ;;  %v4962_v42 = vand.u32 4294901760, %v4961_v27 }
 0x194   : > { %7092 = vmatprep.mubr.msk.f32.mxu0 %vm7382_vm1, %v7381_v22  ;;  %7102 = vmatprep.subr.mxu0 %v7381_v22 }
 0x195   : > { %7082 = vmatpush3.msra.mxu1 %v3578_v2  ;;  %7093 = vmatmul.mubr.f32.vlgmr.msra.gmra.mxu0 %v7949_v26  ;;  %v4501_v35 = vand.u32 4294901760, %v4500_v36  ;;  %v8308_v28 = vand.u32 4294901760, %v1614_v16 }
 0x196   : > { %7103 = vmatpush3.msra.mxu0 %v3576_v41  ;;  %7083 = vmatprep.subr.mxu1 %v7381_v22  ;;  %v1420_v41 = vpop.f32.mrf.mxu0 }
 0x197   : > { %7104 = vmatprep.subr.mxu0 %v7381_v22  ;;  %7084 = vmatpush3.msra.mxu1 %v3585_v11  ;;  %v4502_v21 = vsub.f32 %v4500_v36, %v4501_v35  ;;  %v1421_v29 = vadd.f32 %v1420_v41, %v7958_v9 }
 0x198   : > { %7085 = vmatprep.mubr.msk.f32.mxu1 %vm7382_vm1, %v7381_v22  ;;  %7105 = vmatpush3.msra.mxu0 %v3583_v10  ;;  %v6871_v11 = vpop.f32.mrf.mxu0 }
 0x199   : > { %7086 = vmatmul.mubr.f32.vlgmr.msra.gmra.mxu1 %v7940_v8  ;;  %7095 = vmatprep.subr.mxu1 %v7381_v22  ;;  %v1608_v13 = vadd.f32 %v1607_v7, %v1421_v29 }
 0x19a   : > { %7106 = vmatprep.mubr.msk.f32.mxu0 %vm7382_vm1, %v7381_v22  ;;  %7116 = vmatprep.subr.mxu0 %v7381_v22  ;;  %v1432_v6 = vpop.f32.mrf.mxu0 }
 0x19b   : > { %7096 = vmatpush3.msra.mxu1 %v8132_v53  ;;  %7107 = vmatmul.mubr.f32.vlgmr.msra.gmra.mxu0 %v7940_v8  ;;  %v8312_v2 = vand.u32 4294901760, %v1608_v13  ;;  %v1433_v4 = vadd.f32 %v1432_v6, %v7973_v3 }
 0x19c   : > { %7117 = vmatpush3.msra.mxu0 %v8176_v50  ;;  %7097 = vmatprep.subr.mxu1 %v7381_v22 }
 0x19d   : > { %7118 = vmatprep.subr.mxu0 %v7381_v22  ;;  %7098 = vmatpush3.msra.mxu1 %v8136_v45 }
 0x19e   : > { %7099 = vmatprep.mubr.msk.f32.mxu1 %vm7382_vm1, %v7381_v22  ;;  %7119 = vmatpush3.msra.mxu0 %v8180_v48 }
 0x19f   : > { %7100 = vmatmul.mubr.f32.vlgmr.msra.gmra.mxu1 %v7962_v24  ;;  %7109 = vmatprep.subr.mxu1 %v7381_v22 }
 0x1a0   : > { %7120 = vmatprep.mubr.msk.f32.mxu0 %vm7382_vm1, %v7381_v22  ;;  %7130 = vmatprep.subr.mxu0 %v7381_v22 }
 0x1a1   : > { %7110 = vmatpush3.msra.mxu1 %v8132_v53  ;;  %7121 = vmatmul.mubr.f32.vlgmr.msra.gmra.mxu0 %v7982_v62  ;;  %v4503_v53 = vand.u32 4294901760, %v4502_v21 }
 0x1a2   : > { %7131 = vmatpush3.msra.mxu0 %v4034_v23  ;;  %7111 = vmatprep.subr.mxu1 %v7381_v22 }
 0x1a3   : > { %7132 = vmatprep.subr.mxu0 %v7381_v22  ;;  %7112 = vmatpush3.msra.mxu1 %v8136_v45  ;;  %v4952_v45 = vsub.f32 %v1602_v40, %v8264_v55 }
 0x1a4   : > { %7113 = vmatprep.mubr.msk.f32.mxu1 %vm7382_vm1, %v7381_v22  ;;  %7133 = vmatpush3.msra.mxu0 %v4041_v54  ;;  %v6905_v54 = vpop.f32.mrf.mxu1 }
 0x1a5   : > { %7114 = vmatmul.mubr.f32.vlgmr.msra.gmra.mxu1 %v7940_v8  ;;  %7123 = vmatprep.subr.mxu1 %v7381_v22  ;;  %v4953_v30 = vand.u32 4294901760, %v4952_v45 }
 0x1a6   : > { %7134 = vmatprep.mubr.msk.f32.mxu0 %vm7382_vm1, %v7381_v22  ;;  %7144 = vmatprep.subr.mxu0 %v7381_v22 }
 0x1a7   : > { %7124 = vmatpush3.msra.mxu1 %v4037_v58  ;;  %7135 = vmatmul.mubr.f32.vlgmr.msra.gmra.mxu0 %v7949_v26  ;;  %v4954_v10 = vsub.f32 %v4952_v45, %v4953_v30 }
 0x1a8   : > { %7145 = vmatpush3.msra.mxu0 %v4035_v57  ;;  %7125 = vmatprep.subr.mxu1 %v7381_v22  ;;  %v1439_v57 = vadd.f32 %v6871_v11, %v7965_v43 }
 0x1a9   : > { %7146 = vmatprep.subr.mxu0 %v7381_v22  ;;  %7126 = vmatpush3.msra.mxu1 %v4044_v14  ;;  %v4955_v9 = vand.u32 4294901760, %v4954_v10 }
 0x1aa   : > { %7127 = vmatprep.mubr.msk.f32.mxu1 %vm7382_vm1, %v7381_v22  ;;  %7147 = vmatpush3.msra.mxu0 %v4042_v31  ;;  %v1619_v31 = vpop.f32.mrf.mxu1  ;;  %v1626_v63 = vadd.f32 %v6905_v54, %v1439_v57 }
 0x1ab   : > { %7128 = vmatmul.mubr.f32.vlgmr.msra.gmra.mxu1 %v7940_v8  ;;  %7137 = vmatprep.subr.mxu1 %v7381_v22  ;;  %v1620_v1 = vadd.f32 %v1619_v31, %v1433_v4 }
 0x1ac   : > { %7148 = vmatprep.mubr.msk.f32.mxu0 %vm7382_vm1, %v7381_v22  ;;  %7158 = vmatprep.subr.mxu0 %v7381_v22  ;;  %v8352_v20 = vand.u32 4294901760, %v1626_v63 }
 0x1ad   : > { %7138 = vmatpush3.msra.mxu1 %v8176_v50  ;;  %7149 = vmatmul.mubr.f32.vlgmr.msra.gmra.mxu0 %v7940_v8  ;;  %v5795_v46 = vand.u32 4294901760, %v1620_v1 }
 0x1ae   : > { %7159 = vmatpush3.msra.mxu0 %v8220_v25  ;;  %7139 = vmatprep.subr.mxu1 %v7381_v22  ;;  %v5870_v39 = vsub.f32 %v1626_v63, %v8352_v20 }
 0x1af   : > { %7160 = vmatprep.subr.mxu0 %v7381_v22  ;;  %7140 = vmatpush3.msra.mxu1 %v8180_v48  ;;  %v5877_v58 = vsub.f32 %v1620_v1, %v5795_v46 }
 0x1b0   : > { %7141 = vmatprep.mubr.msk.f32.mxu1 %vm7382_vm1, %v7381_v22  ;;  %7161 = vmatpush3.msra.mxu0 %v8224_v15 }
 0x1b1   : > { %7142 = vmatmul.mubr.f32.vlgmr.msra.gmra.mxu1 %v7962_v24  ;;  %7151 = vmatprep.subr.mxu1 %v7381_v22  ;;  %v5878_v14 = vand.u32 4294901760, %v5877_v58 }
 0x1b2   : > { %7162 = vmatprep.mubr.msk.f32.mxu0 %vm7382_vm1, %v7381_v22  ;;  %7172 = vmatprep.subr.mxu0 %v7381_v22 }
 0x1b3   : > { %7152 = vmatpush3.msra.mxu1 %v8176_v50  ;;  %7163 = vmatmul.mubr.f32.vlgmr.msra.gmra.mxu0 %v7982_v62  ;;  %v5411_v50 = vsub.f32 %v1614_v16, %v8308_v28 }
 0x1b4   : > { %7173 = vmatpush3.msra.mxu0 %v4493_v60  ;;  %7153 = vmatprep.subr.mxu1 %v7381_v22  ;;  %v5879_v60 = vsub.f32 %v5877_v58, %v5878_v14 }
 0x1b5   : > { %7174 = vmatprep.subr.mxu0 %v7381_v22  ;;  %7154 = vmatpush3.msra.mxu1 %v8180_v48  ;;  %v5418_v48 = vsub.f32 %v1608_v13, %v8312_v2  ;;  %v5412_v23 = vand.u32 4294901760, %v5411_v50 }
 0x1b6   : > { %7155 = vmatprep.mubr.msk.f32.mxu1 %vm7382_vm1, %v7381_v22  ;;  %7175 = vmatpush3.msra.mxu0 %v4500_v36 }
 0x1b7   : > { %7156 = vmatmul.mubr.f32.vlgmr.msra.gmra.mxu1 %v7940_v8  ;;  %7165 = vmatprep.subr.mxu1 %v7381_v22  ;;  %v5419_v34 = vand.u32 4294901760, %v5418_v48  ;;  %v5413_v19 = vsub.f32 %v5411_v50, %v5412_v23 }
 0x1b8   : > { %7176 = vmatprep.mubr.msk.f32.mxu0 %vm7382_vm1, %v7381_v22  ;;  %7186 = vmatprep.subr.mxu0 %v7381_v22 }
 0x1b9   : > { %7166 = vmatpush3.msra.mxu1 %v4496_v12  ;;  %7177 = vmatmul.mubr.f32.vlgmr.msra.gmra.mxu0 %v7949_v26  ;;  %v5420_v43 = vsub.f32 %v5418_v48, %v5419_v34  ;;  %v5414_v3 = vand.u32 4294901760, %v5413_v19 }
 0x1ba   : > { %7187 = vmatpush3.msra.mxu0 %v4494_v47  ;;  %7167 = vmatprep.subr.mxu1 %v7381_v22 }
 0x1bb   : > { %7188 = vmatprep.subr.mxu0 %v7381_v22  ;;  %7168 = vmatpush3.msra.mxu1 %v4503_v53  ;;  %v5421_v51 = vand.u32 4294901760, %v5420_v43 }
 0x1bc   : > { %7169 = vmatprep.mubr.msk.f32.mxu1 %vm7382_vm1, %v7381_v22  ;;  %7189 = vmatpush3.msra.mxu0 %v4501_v35 }
 0x1bd   : > { %7170 = vmatmul.mubr.f32.vlgmr.msra.gmra.mxu1 %v7940_v8  ;;  %7179 = vmatprep.subr.mxu1 %v7381_v22 }
 0x1be   : > { %7190 = vmatprep.mubr.msk.f32.mxu0 %vm7382_vm1, %v7381_v22  ;;  %7200 = vmatprep.subr.mxu0 %v7381_v22 }
 0x1bf   : > { %7180 = vmatpush3.msra.mxu1 %v8220_v25  ;;  %7191 = vmatmul.mubr.f32.vlgmr.msra.gmra.mxu0 %v7940_v8 }
 0x1c0   : > { %7201 = vmatpush3.msra.mxu0 %v8264_v55  ;;  %7181 = vmatprep.subr.mxu1 %v7381_v22 }
 0x1c1   : > { %7202 = vmatprep.subr.mxu0 %v7381_v22  ;;  %7182 = vmatpush3.msra.mxu1 %v8224_v15 }
 0x1c2   : > { %7183 = vmatprep.mubr.msk.f32.mxu1 %vm7382_vm1, %v7381_v22  ;;  %7203 = vmatpush3.msra.mxu0 %v8268_v61 }
 0x1c3   : > { %7184 = vmatmul.mubr.f32.vlgmr.msra.gmra.mxu1 %v7962_v24  ;;  %7193 = vmatprep.subr.mxu1 %v7381_v22 }
 0x1c4   : > { %7204 = vmatprep.mubr.msk.f32.mxu0 %vm7382_vm1, %v7381_v22  ;;  %7214 = vmatprep.subr.mxu0 %v7381_v22 }
 0x1c5   : > { %7194 = vmatpush3.msra.mxu1 %v8220_v25  ;;  %7205 = vmatmul.mubr.f32.vlgmr.msra.gmra.mxu0 %v7982_v62  ;;  %v5871_v25 = vand.u32 4294901760, %v5870_v39 }
 0x1c6   : > { %7215 = vmatpush3.msra.mxu0 %v4952_v45  ;;  %7195 = vmatprep.subr.mxu1 %v7381_v22 }
 0x1c7   : > { %7216 = vmatprep.subr.mxu0 %v7381_v22  ;;  %7196 = vmatpush3.msra.mxu1 %v8224_v15  ;;  %v5872_v15 = vsub.f32 %v5870_v39, %v5871_v25 }
 0x1c8   : > { %7197 = vmatprep.mubr.msk.f32.mxu1 %vm7382_vm1, %v7381_v22  ;;  %7217 = vmatpush3.msra.mxu0 %v4959_v59 }
 0x1c9   : > { %7198 = vmatmul.mubr.f32.vlgmr.msra.gmra.mxu1 %v7940_v8  ;;  %7207 = vmatprep.subr.mxu1 %v7381_v22  ;;  %v5873_v17 = vand.u32 4294901760, %v5872_v15 }
 0x1ca   : > { %7218 = vmatprep.mubr.msk.f32.mxu0 %vm7382_vm1, %v7381_v22  ;;  %7228 = vmatprep.subr.mxu0 %v7381_v22 }
 0x1cb   : > { %7208 = vmatpush3.msra.mxu1 %v4955_v9  ;;  %7219 = vmatmul.mubr.f32.vlgmr.msra.gmra.mxu0 %v7949_v26 }
 0x1cc   : > { %7229 = vmatpush3.msra.mxu0 %v4953_v30  ;;  %7209 = vmatprep.subr.mxu1 %v7381_v22 }
 0x1cd   : > { %7230 = vmatprep.subr.mxu0 %v7381_v22  ;;  %7210 = vmatpush3.msra.mxu1 %v4962_v42 }
 0x1ce   : > { %7211 = vmatprep.mubr.msk.f32.mxu1 %vm7382_vm1, %v7381_v22  ;;  %7231 = vmatpush3.msra.mxu0 %v4960_v33 }
 0x1cf   : > { %7212 = vmatmul.mubr.f32.vlgmr.msra.gmra.mxu1 %v7940_v8  ;;  %7221 = vmatprep.subr.mxu1 %v7381_v22 }
 0x1d0   : > { %7232 = vmatprep.mubr.msk.f32.mxu0 %vm7382_vm1, %v7381_v22  ;;  %7242 = vmatprep.subr.mxu0 %v7381_v22 }
 0x1d1   : > { %7222 = vmatpush3.msra.mxu1 %v8264_v55  ;;  %7233 = vmatmul.mubr.f32.vlgmr.msra.gmra.mxu0 %v7940_v8 }
 0x1d2   : > { %7243 = vmatpush3.msra.mxu0 %v8308_v28  ;;  %7223 = vmatprep.subr.mxu1 %v7381_v22 }
 0x1d3   : > { %7244 = vmatprep.subr.mxu0 %v7381_v22  ;;  %7224 = vmatpush3.msra.mxu1 %v8268_v61 }
 0x1d4   : > { %7225 = vmatprep.mubr.msk.f32.mxu1 %vm7382_vm1, %v7381_v22  ;;  %7245 = vmatpush3.msra.mxu0 %v8312_v2 }
 0x1d5   : > { %7226 = vmatmul.mubr.f32.vlgmr.msra.gmra.mxu1 %v7962_v24  ;;  %7235 = vmatprep.subr.mxu1 %v7381_v22 }
 0x1d6   : > { %7246 = vmatprep.mubr.msk.f32.mxu0 %vm7382_vm1, %v7381_v22  ;;  %7256 = vmatprep.subr.mxu0 %v7381_v22 }
 0x1d7   : > { %7236 = vmatpush3.msra.mxu1 %v8264_v55  ;;  %7247 = vmatmul.mubr.f32.vlgmr.msra.gmra.mxu0 %v7982_v62 }
 0x1d8   : > { %7257 = vmatpush3.msra.mxu0 %v5411_v50  ;;  %7237 = vmatprep.subr.mxu1 %v7381_v22 }
 0x1d9   : > { %7258 = vmatprep.subr.mxu0 %v7381_v22  ;;  %7238 = vmatpush3.msra.mxu1 %v8268_v61 }
 0x1da   : > { %7239 = vmatprep.mubr.msk.f32.mxu1 %vm7382_vm1, %v7381_v22  ;;  %7259 = vmatpush3.msra.mxu0 %v5418_v48 }
 0x1db   : > { %7240 = vmatmul.mubr.f32.vlgmr.msra.gmra.mxu1 %v7940_v8  ;;  %7249 = vmatprep.subr.mxu1 %v7381_v22 }
 0x1dc   : > { %7260 = vmatprep.mubr.msk.f32.mxu0 %vm7382_vm1, %v7381_v22  ;;  %7270 = vmatprep.subr.mxu0 %v7381_v22 }
 0x1dd   : > { %7250 = vmatpush3.msra.mxu1 %v5414_v3  ;;  %7261 = vmatmul.mubr.f32.vlgmr.msra.gmra.mxu0 %v7949_v26 }
 0x1de   : > { %7271 = vmatpush3.msra.mxu0 %v5412_v23  ;;  %7251 = vmatprep.subr.mxu1 %v7381_v22 }
 0x1df   : > { %7272 = vmatprep.subr.mxu0 %v7381_v22  ;;  %7252 = vmatpush3.msra.mxu1 %v5421_v51 }
 0x1e0   : > { %7253 = vmatprep.mubr.msk.f32.mxu1 %vm7382_vm1, %v7381_v22  ;;  %7273 = vmatpush3.msra.mxu0 %v5419_v34 }
 0x1e1   : > { %7254 = vmatmul.mubr.f32.vlgmr.msra.gmra.mxu1 %v7940_v8  ;;  %7263 = vmatprep.subr.mxu1 %v7381_v22 }
 0x1e2   : > { %7274 = vmatprep.mubr.msk.f32.mxu0 %vm7382_vm1, %v7381_v22  ;;  %7284 = vmatprep.subr.mxu0 %v7381_v22 }
 0x1e3   : > { %7264 = vmatpush3.msra.mxu1 %v8308_v28  ;;  %7275 = vmatmul.mubr.f32.vlgmr.msra.gmra.mxu0 %v7940_v8 }
 0x1e4   : > { %7285 = vmatpush3.msra.mxu0 %v8352_v20  ;;  %7265 = vmatprep.subr.mxu1 %v7381_v22 }
 0x1e5   : > { %7286 = vmatprep.subr.mxu0 %v7381_v22  ;;  %7266 = vmatpush3.msra.mxu1 %v8312_v2 }
 0x1e6   : > { %7267 = vmatprep.mubr.msk.f32.mxu1 %vm7382_vm1, %v7381_v22  ;;  %7287 = vmatpush3.msra.mxu0 %v5795_v46 }
 0x1e7   : > { %7268 = vmatmul.mubr.f32.vlgmr.msra.gmra.mxu1 %v7962_v24  ;;  %7277 = vmatprep.subr.mxu1 %v7381_v22 }
 0x1e8   : > { %7288 = vmatprep.mubr.msk.f32.mxu0 %vm7382_vm1, %v7381_v22  ;;  %7298 = vmatprep.subr.mxu0 %v7381_v22 }
 0x1e9   : > { %7278 = vmatpush3.msra.mxu1 %v8308_v28  ;;  %7289 = vmatmul.mubr.f32.vlgmr.msra.gmra.mxu0 %v7982_v62  ;;  %v5880_v62 = vand.u32 4294901760, %v5879_v60 }
 0x1ea   : > { %7299 = vmatpush3.msra.mxu0 %v5870_v39  ;;  %7279 = vmatprep.subr.mxu1 %v7381_v22 }
 0x1eb   : > { %7300 = vmatprep.subr.mxu0 %v7381_v22  ;;  %7280 = vmatpush3.msra.mxu1 %v8312_v2 }
 0x1ec   : > { %7281 = vmatprep.mubr.msk.f32.mxu1 %vm7382_vm1, %v7381_v22  ;;  %7301 = vmatpush3.msra.mxu0 %v5877_v58 }
 0x1ed   : > { %7282 = vmatmul.mubr.f32.vlgmr.msra.gmra.mxu1 %v7940_v8  ;;  %7291 = vmatprep.subr.mxu1 %v7381_v22 }
 0x1ee   : > { %7302 = vmatprep.mubr.msk.f32.mxu0 %vm7382_vm1, %v7381_v22  ;;  %7312 = vmatprep.subr.mxu0 %v7381_v22 }
 0x1ef   : > { %7292 = vmatpush3.msra.mxu1 %v5873_v17  ;;  %7303 = vmatmul.mubr.f32.vlgmr.msra.gmra.mxu0 %v7949_v26 }
 0x1f0   : > { %7313 = vmatpush3.msra.mxu0 %v5871_v25  ;;  %7293 = vmatprep.subr.mxu1 %v7381_v22 }
 0x1f1   : > { %7314 = vmatprep.subr.mxu0 %v7381_v22  ;;  %7294 = vmatpush3.msra.mxu1 %v5880_v62 }
 0x1f2   : > { %7295 = vmatprep.mubr.msk.f32.mxu1 %vm7382_vm1, %v7381_v22  ;;  %7315 = vmatpush3.msra.mxu0 %v5878_v14 }
 0x1f3   : > { %7296 = vmatmul.mubr.f32.vlgmr.msra.gmra.mxu1 %v7940_v8  ;;  %7305 = vmatprep.subr.mxu1 %v7381_v22 }
 0x1f4   : > { %7306 = vmatpush3.msra.mxu1 %v8352_v20  ;;  %7309 = vmatprep.mubr.msk.f32.mxu1 %vm7382_vm1, %v7381_v22 }
 0x1f5   : > { %7307 = vmatprep.subr.mxu1 %v7381_v22  ;;  %7316 = vmatprep.mubr.msk.f32.mxu0 %vm7382_vm1, %v7381_v22 }
 0x1f6   : > { %7308 = vmatpush3.msra.mxu1 %v5795_v46  ;;  %7317 = vmatmul.mubr.f32.vlgmr.msra.gmra.mxu0 %v7940_v8 }
 0x1f7   : > { %7310 = vmatmul.mubr.f32.vlgmr.msra.gmra.mxu1 %v7962_v24  ;;  %7319 = vmatprep.subr.mxu1 %v7381_v22 }
 0x1f8   : > { %7320 = vmatpush3.msra.mxu1 %v8352_v20  ;;  %7323 = vmatprep.mubr.msk.f32.mxu1 %vm7382_vm1, %v7381_v22 }
 0x1f9   : > { %7321 = vmatprep.subr.mxu1 %v7381_v22 }
 0x1fa   : > { %7322 = vmatpush3.msra.mxu1 %v5795_v46 }
 0x1fb   : > { %7324 = vmatmul.mubr.f32.vlgmr.msra.gmra.mxu1 %v7940_v8 }
 0x209   : > { %v1705_v26 = vpop.f32.mrf.mxu0 }
 0x20b   : > { %v6912_v36 = vpop.f32.mrf.mxu0 }
 0x20d   : > { %v1862_v47 = vpop.f32.mrf.mxu0 }
 0x20f   : > { %v6926_v18 = vpop.f32.mrf.mxu0 }
 0x212   : > { %v1786_v37 = vpop.f32.mrf.mxu1 }
 0x213   : > { %v1787_v32 = vadd.f32 %v1786_v37, %v1705_v26  ;;  %v2014_v35 = vpop.f32.mrf.mxu0 }
 0x214   : > { %v6919_v24 = vpop.f32.mrf.mxu1 }
 0x215   : > { %v1863_v38 = vadd.f32 %v1862_v47, %v1787_v32  ;;  %v6940_v56 = vpop.f32.mrf.mxu0 }
 0x217   : > { %v1937_v5 = vpop.f32.mrf.mxu1 }
 0x218   : > { %v1938_v21 = vadd.f32 %v1937_v5, %v1863_v38 }
 0x219   : > { %v6933_v40 = vpop.f32.mrf.mxu1  ;;  %v2164_v49 = vpop.f32.mrf.mxu0 }
 0x21a   : > { %v2015_v12 = vadd.f32 %v2014_v35, %v1938_v21 }
 0x21b   : > { %v6954_v55 = vpop.f32.mrf.mxu0 }
 0x21d   : > { %v2087_v22 = vpop.f32.mrf.mxu1 }
 0x21e   : > { %v2088_v53 = vadd.f32 %v2087_v22, %v2015_v12 }
 0x21f   : > { %v6947_v61 = vpop.f32.mrf.mxu1  ;;  %v2321_v8 = vpop.f32.mrf.mxu0 }
 0x220   : > { %v8411_v51 = vmul.f32 %v2088_v53, %v2088_v53 }
 0x221   : > { %v6968_v45 = vpop.f32.mrf.mxu0 }
 0x223   : > { %v2245_v52 = vpop.f32.mrf.mxu1 }
 0x224   : > { %v2246_v59 = vadd.f32 %v2245_v52, %v2164_v49 }
 0x225   : > { %v6961_v30 = vpop.f32.mrf.mxu1  ;;  %v2473_v41 = vpop.f32.mrf.mxu0 }
 0x226   : > { %v2322_v0 = vadd.f32 %v2321_v8, %v2246_v59 }
 0x227   : > { %v6982_v44 = vpop.f32.mrf.mxu0 }
 0x229   : > { %v2396_v33 = vpop.f32.mrf.mxu1 }
 0x22a   : > { %v2397_v10 = vadd.f32 %v2396_v33, %v2322_v0 }
 0x22b   : > { %v6975_v29 = vpop.f32.mrf.mxu1  ;;  %v2623_v7 = vpop.f32.mrf.mxu0 }
 0x22c   : > { %v2474_v27 = vadd.f32 %v2473_v41, %v2397_v10 }
 0x22d   : > { %v6996_v16 = vpop.f32.mrf.mxu0 }
 0x22f   : > { %v2546_v13 = vpop.f32.mrf.mxu1 }
 0x230   : > { %v2547_v9 = vadd.f32 %v2546_v13, %v2474_v27 }
 0x231   : > { %v6989_v28 = vpop.f32.mrf.mxu1  ;;  %v2780_v42 = vpop.f32.mrf.mxu0 }
 0x232   : > { %v8421_v21 = vmul.f32 %v2547_v9, %v2547_v9 }
 0x233   : > { %v7010_v2 = vpop.f32.mrf.mxu0 }
 0x235   : > { %v2704_v50 = vpop.f32.mrf.mxu1 }
 0x236   : > { %v2705_v11 = vadd.f32 %v2704_v50, %v2623_v7 }
 0x237   : > { %v7003_v48 = vpop.f32.mrf.mxu1  ;;  %v2932_v23 = vpop.f32.mrf.mxu0 }
 0x238   : > { %v2781_v6 = vadd.f32 %v2780_v42, %v2705_v11 }
 0x239   : > { %v7024_v54 = vpop.f32.mrf.mxu0 }
 0x23b   : > { %v2855_v57 = vpop.f32.mrf.mxu1 }
 0x23c   : > { %v2856_v34 = vadd.f32 %v2855_v57, %v2781_v6 }
 0x23d   : > { %v7017_v19 = vpop.f32.mrf.mxu1  ;;  %v3082_v4 = vpop.f32.mrf.mxu0 }
 0x23e   : > { %v2933_v31 = vadd.f32 %v2932_v23, %v2856_v34 }
 0x23f   : > { %v7038_v43 = vpop.f32.mrf.mxu0 }
 0x241   : > { %v3005_v63 = vpop.f32.mrf.mxu1 }
 0x242   : > { %v3006_v1 = vadd.f32 %v3005_v63, %v2933_v31 }
 0x243   : > { %v7031_v3 = vpop.f32.mrf.mxu1  ;;  %v3239_v20 = vpop.f32.mrf.mxu0 }
 0x244   : > { %v8413_v46 = vmul.f32 %v3006_v1, %v3006_v1  ;;  %v8415_v39 = vmul.f32 %v3006_v1, %v2088_v53 }
 0x245   : > { %v7052_v58 = vpop.f32.mrf.mxu0 }
 0x246   : > { %v8419_v25 = vadd.f32 %v8413_v46, %v8411_v51 }
 0x247   : > { %v3163_v14 = vpop.f32.mrf.mxu1 }
 0x248   : > { %v3164_v15 = vadd.f32 %v3163_v14, %v3082_v4 }
 0x249   : > { %v7045_v60 = vpop.f32.mrf.mxu1  ;;  %v3391_v17 = vpop.f32.mrf.mxu0 }
 0x24a   : > { %v3240_v62 = vadd.f32 %v3239_v20, %v3164_v15 }
 0x24b   : > { %v7066_v26 = vpop.f32.mrf.mxu0 }
 0x24d   : > { %v3314_v36 = vpop.f32.mrf.mxu1 }
 0x24e   : > { %v3315_v47 = vadd.f32 %v3314_v36, %v3240_v62 }
 0x24f   : > { %v7059_v18 = vpop.f32.mrf.mxu1  ;;  %v3541_v37 = vpop.f32.mrf.mxu0 }
 0x250   : > { %v3392_v32 = vadd.f32 %v3391_v17, %v3315_v47 }
 0x251   : > { %v7080_v35 = vpop.f32.mrf.mxu0 }
 0x253   : > { %v3464_v24 = vpop.f32.mrf.mxu1 }
 0x254   : > { %v3465_v38 = vadd.f32 %v3464_v24, %v3392_v32 }
 0x255   : > { %v7073_v56 = vpop.f32.mrf.mxu1  ;;  %v3698_v5 = vpop.f32.mrf.mxu0 }
 0x256   : > { %v8423_v40 = vmul.f32 %v3465_v38, %v3465_v38  ;;  %v8425_v49 = vmul.f32 %v3465_v38, %v2547_v9  ;;  %v8434_v38 = vstv %s267_s16  ;;  %v8436_v56 = vstv %s6384_s17 }
 0x257   : > { %v7094_v12 = vpop.f32.mrf.mxu0 }
 0x258   : > { %v8429_v55 = vadd.f32 %v8423_v40, %v8421_v21 }
 0x259   : > { %v3622_v22 = vpop.f32.mrf.mxu1 }
 0x25a   : > { %v3623_v53 = vadd.f32 %v3622_v22, %v3541_v37  ;;  %v6248_v22 = vadd.f32 %v8419_v25, %v8434_v38 }
 0x25b   : > { %v7087_v61 = vpop.f32.mrf.mxu1  ;;  %v3850_v8 = vpop.f32.mrf.mxu0 }
 0x25c   : > { %v3699_v45 = vadd.f32 %v3698_v5, %v3623_v53 }
 0x25d   : > { %v7108_v52 = vpop.f32.mrf.mxu0 }
 0x25f   : > { %v3773_v59 = vpop.f32.mrf.mxu1 }
 0x260   : > { %v3774_v30 = vadd.f32 %v3773_v59, %v3699_v45 }
 0x261   : > { %v7101_v41 = vpop.f32.mrf.mxu1  ;;  %v4000_v0 = vpop.f32.mrf.mxu0 }
 0x262   : > { %v3851_v44 = vadd.f32 %v3850_v8, %v3774_v30 }
 0x263   : > { %v7122_v33 = vpop.f32.mrf.mxu0 }
 0x265   : > { %v3923_v10 = vpop.f32.mrf.mxu1 }
 0x266   : > { %v3924_v29 = vadd.f32 %v3923_v10, %v3851_v44 }
 0x267   : > { %v7115_v7 = vpop.f32.mrf.mxu1  ;;  %v4157_v27 = vpop.f32.mrf.mxu0 }
 0x268   : > { %v6228_v16 = vsub.f32 %v3924_v29, %v8411_v51 }
 0x269   : > { %v7136_v13 = vpop.f32.mrf.mxu0 }
 0x26b   : > { %v4081_v9 = vpop.f32.mrf.mxu1 }
 0x26c   : > { %v4082_v28 = vadd.f32 %v4081_v9, %v4000_v0 }
 0x26d   : > { %v7129_v42 = vpop.f32.mrf.mxu1  ;;  %v4309_v2 = vpop.f32.mrf.mxu0 }
 0x26e   : > { %v4158_v50 = vadd.f32 %v4157_v27, %v4082_v28  ;;  %v6249_v42 = vadd.f32 %v8429_v55, %v8434_v38  ;;  %v6234_v55 = vmul.f32 2.0, %v8415_v39 }
 0x26f   : > { %v7150_v11 = vpop.f32.mrf.mxu0 }
 0x271   : > { %v4232_v48 = vpop.f32.mrf.mxu1 }
 0x272   : > { %v4233_v23 = vadd.f32 %v4232_v48, %v4158_v50 }
 0x273   : > { %v7143_v6 = vpop.f32.mrf.mxu1  ;;  %v4459_v54 = vpop.f32.mrf.mxu0 }
 0x274   : > { %v4310_v57 = vadd.f32 %v4309_v2, %v4233_v23 }
 0x275   : > { %v7164_v34 = vpop.f32.mrf.mxu0 }
 0x277   : > { %v4382_v19 = vpop.f32.mrf.mxu1 }
 0x278   : > { %v4383_v4 = vadd.f32 %v4382_v19, %v4310_v57 }
 0x279   : > { %v7157_v31 = vpop.f32.mrf.mxu1  ;;  %v4616_v43 = vpop.f32.mrf.mxu0 }
 0x27a   : > { %v6229_v63 = vsub.f32 %v4383_v4, %v8421_v21 }
 0x27b   : > { %v7178_v1 = vpop.f32.mrf.mxu0 }
 0x27d   : > { %v4540_v3 = vpop.f32.mrf.mxu1 }
 0x27e   : > { %v4541_v20 = vadd.f32 %v4540_v3, %v4459_v54 }
 0x27f   : > { %v7171_v51 = vpop.f32.mrf.mxu1  ;;  %v4768_v58 = vpop.f32.mrf.mxu0 }
 0x280   : > { %v4617_v14 = vadd.f32 %v4616_v43, %v4541_v20 }
 0x281   : > { %v7192_v15 = vpop.f32.mrf.mxu0 }
 0x282   : > { %v6237_v15 = vadd.f32 %v8434_v38, %v6234_v55 }
 0x283   : > { %v4691_v60 = vpop.f32.mrf.mxu1 }
 0x284   : > { %v4692_v17 = vadd.f32 %v4691_v60, %v4617_v14 }
 0x285   : > { %v7185_v62 = vpop.f32.mrf.mxu1  ;;  %v4918_v26 = vpop.f32.mrf.mxu0 }
 0x286   : > { %v4769_v36 = vadd.f32 %v4768_v58, %v4692_v17 }
 0x287   : > { %v7206_v47 = vpop.f32.mrf.mxu0 }
 0x289   : > { %v4841_v18 = vpop.f32.mrf.mxu1 }
 0x28a   : > { %v4842_v37 = vadd.f32 %v4841_v18, %v4769_v36 }
 0x28b   : > { %v7199_v32 = vpop.f32.mrf.mxu1  ;;  %v5075_v35 = vpop.f32.mrf.mxu0 }
 0x28c   : > { %v6230_v24 = vsub.f32 %v4842_v37, %v8413_v46 }
 0x28d   : > { %v7220_v5 = vpop.f32.mrf.mxu0 }
 0x28e   : > { %v6250_v21 = vadd.f32 %v6230_v24, %v6228_v16  ;;  %v6265_v24 = vlaneseq }
 0x28f   : > { %v4999_v12 = vpop.f32.mrf.mxu1 }
 0x290   : > { %v6252_v53 = vadd.f32 %v6250_v21, %v8436_v56  ;;  %v5000_v61 = vadd.f32 %v4999_v12, %v4918_v26 }
 0x291   : > { %v7213_v8 = vpop.f32.mrf.mxu1  ;;  %v5227_v45 = vpop.f32.mrf.mxu0 }
 0x292   : > { %v6254_v52 = vmul.f32 %v6252_v53, %v6248_v22  ;;  %v5076_v59 = vadd.f32 %v5075_v35, %v5000_v61  ;;  %v6266_v53 = vand.u32 127, %v6265_v24  ;;  %v6261_v61 = vstv %s7448_s30 }
 0x293   : > { %v7234_v30 = vpop.f32.mrf.mxu0  ;;  %vm6263_vm2 = vcmp.lt.s32.totalorder %v6261_v61, 8 }
 0x294   : > { %7349 = vrcp.f32 %v6254_v52  ;;  %vm6267_vm3 = vcmp.lt.s32.totalorder %v6266_v53, 6  ;;  %vm6288_vm9 = vcmp.eq.s32.totalorder %v6266_v53, 0 }
 0x295   : > { %v5150_v41 = vpop.f32.mrf.mxu1  ;;  %vm6268_vm5 = vmand %vm6263_vm2, %vm6267_vm3 }
 0x296   : > { %v5151_v46 = vadd.f32 %v5150_v41, %v5076_v59  ;;  %v6262_v59 = vadd.s32 1, %v6261_v61 }
 0x297   : > { %v7227_v0 = vpop.f32.mrf.mxu1  ;;  %v5377_v44 = vpop.f32.mrf.mxu0 }
 0x298   : > { %v5228_v33 = vadd.f32 %v5227_v45, %v5151_v46  ;;  %v6235_v45 = vmul.f32 2.0, %v8425_v49  ;;  %vm6264_vm4 = vcmp.lt.s32.totalorder %v6262_v59, 8 }
 0x299   : > { %v7248_v10 = vpop.f32.mrf.mxu0  ;;  %vm6269_vm6 = vmand %vm6264_vm4, %vm6267_vm3 }
 0x29a   : > { %v6238_v41 = vadd.f32 %v8434_v38, %v6235_v45 }
 0x29b   : > { %v5300_v29 = vpop.f32.mrf.mxu1 }
 0x29c   : > { %v5301_v7 = vadd.f32 %v5300_v29, %v5228_v33 }
 0x29d   : > { %v7241_v27 = vpop.f32.mrf.mxu1  ;;  %v5534_v16 = vpop.f32.mrf.mxu0 }
 0x29e   : > { %v6231_v25 = vsub.f32 %v5301_v7, %v8423_v40 }
 0x29f   : > { %v7262_v13 = vpop.f32.mrf.mxu0 }
 0x2a0   : > { %v6251_v9 = vadd.f32 %v6231_v25, %v6229_v63 }
 0x2a1   : > { %v5458_v28 = vpop.f32.mrf.mxu1  ;;  %v7350_v18 = vpop.eup %7349 }
 0x2a2   : > { %v6253_v2 = vadd.f32 %v6251_v9, %v8436_v56  ;;  %v5459_v50 = vadd.f32 %v5458_v28, %v5377_v44 }
 0x2a3   : > { %v7255_v11 = vpop.f32.mrf.mxu1  ;;  %v5686_v48 = vpop.f32.mrf.mxu0 }
 0x2a4   : > { %v6255_v23 = vmul.f32 %v6253_v2, %v6249_v42  ;;  %v5535_v6 = vadd.f32 %v5534_v16, %v5459_v50  ;;  %v6286_v42 = vshrl.u32 %v6265_v24, 7 }
 0x2a5   : > { %v7276_v54 = vpop.f32.mrf.mxu0 }
 0x2a6   : > { %7351 = vrcp.f32 %v6255_v23  ;;  %vm6287_vm8 = vcmp.eq.s32.totalorder %v6286_v42, 0 }
 0x2a7   : > { %v5609_v57 = vpop.f32.mrf.mxu1  ;;  %vm6289_vm10 = vmand %vm6287_vm8, %vm6288_vm9 }
 0x2a8   : > { %v5610_v34 = vadd.f32 %v5609_v57, %v5535_v6 }
 0x2a9   : > { %v7269_v19 = vpop.f32.mrf.mxu1  ;;  %v5836_v4 = vpop.f32.mrf.mxu0 }
 0x2aa   : > { %v5687_v40 = vadd.f32 %v5686_v48, %v5610_v34 }
 0x2ab   : > { %v7290_v31 = vpop.f32.mrf.mxu0 }
 0x2ad   : > { %v5759_v43 = vpop.f32.mrf.mxu1 }
 0x2ae   : > { %v5760_v63 = vadd.f32 %v5759_v43, %v5687_v40 }
 0x2af   : > { %v7283_v1 = vpop.f32.mrf.mxu1  ;;  %v5993_v3 = vpop.f32.mrf.mxu0 }
 0x2b0   : > { %v6232_v20 = vsub.f32 %v5760_v63, %v8415_v39 }
 0x2b1   : > { %v7304_v51 = vpop.f32.mrf.mxu0 }
 0x2b2   : > { %v6239_v58 = vmul.f32 2.0, %v6232_v20 }
 0x2b3   : > { %v5917_v14 = vpop.f32.mrf.mxu1  ;;  %v7352_v44 = vpop.eup %7351 }
 0x2b4   : > { %v6242_v60 = vadd.f32 %v8436_v56, %v6239_v58  ;;  %v5918_v17 = vadd.f32 %v5917_v14, %v5836_v4 }
 0x2b5   : > { %v7297_v62 = vpop.f32.mrf.mxu1 }
 0x2b6   : > { %v5994_v26 = vadd.f32 %v5993_v3, %v5918_v17  ;;  %v6145_v36 = vpop.f32.mrf.mxu0  ;;  %v6244_v47 = vmul.f32 %v6242_v60, %v6237_v15 }
 0x2b7   : > { %v6068_v37 = vpop.f32.mrf.mxu1 }
 0x2b8   : > { %v6069_v32 = vadd.f32 %v6068_v37, %v5994_v26  ;;  %v6257_v35 = vmul.f32 %v7350_v18, %v6244_v47  ;;  %v7318_v39 = vpop.f32.mrf.mxu0 }
 0x2b9   : > { %v7311_v5 = vpop.f32.mrf.mxu1 }
 0x2ba   : > { %v6146_v21 = vadd.f32 %v6145_v36, %v6069_v32  ;;  %v6270_v10 = vsel %vm6268_vm5, %v6257_v35, 0.0 }
 0x2bb   : > { %v6218_v12 = vpop.f32.mrf.mxu1 }
 0x2bc   : > { %v6219_v22 = vadd.f32 %v6218_v12, %v6146_v21 }
 0x2bd   : > { %v7325_v8 = vpop.f32.mrf.mxu1 }
 0x2be   : > { %v6233_v52 = vsub.f32 %v6219_v22, %v8425_v49  ;;  %v6273_v49 = vsel %vm6272_vm7, %v6270_v10, 0.0 }
 0x2c0   : > { %v6240_v30 = vmul.f32 2.0, %v6233_v52 }
 0x2c2   : > { %v6243_v46 = vadd.f32 %v8436_v56, %v6240_v30 }
 0x2c4   : > { %v6245_v0 = vmul.f32 %v6243_v46, %v6238_v41 }
 0x2c6   : > { %v6259_v33 = vmul.f32 %v7352_v44, %v6245_v0 }
 0x2c8   : > { %v6271_v29 = vsel %vm6269_vm6, %v6259_v33, 0.0 }
 0x2c9   : > { %v6274_v7 = vsel %vm6272_vm7, %v6271_v29, 0.0 }
 0x2ca   : > { %v6275_v27 = vadd.f32 %v6274_v7, %v6273_v49 }
 0x2cc   : > { %6276 = vadd.xlane.f32.xlu0 %v6275_v27 }
 0x355   : > { %v6277_v16 = vpop.xlane.xlu0 %6276 }
 0x356   : > { %v6278_v25 = vrot.slane %v6277_v16, 4 }
 0x358   : > { %v6279_v38 = vadd.f32 %v6278_v25, %v6277_v16 }
 0x35a   : > { %v6280_v13 = vrot.slane %v6279_v38, 2 }
 0x35c   : > { %v6281_v56 = vadd.f32 %v6280_v13, %v6279_v38 }
 0x35e   : > { %v6282_v9 = vrot.slane %v6281_v56, 1 }
 0x360   : > { %v6283_v28 = vadd.f32 %v6282_v9, %v6281_v56 }
 0x362   : > { %7326 = vpush %v6283_v28 }
 0x393   : > { %s7327_s24 = spop %7326 }
 0x394   : > { %v6290_v2 = vstv %s7327_s24 }
 0x395   : > { %v6291_v50 = vsel %vm6289_vm10, %v6290_v2, 0.0 }
 0x396   : > { %6292 = vst [vmem:[%s266_s23] sm:$0xff] %v6291_v50 }
 0x397 PF: > { %s16_s18 = sadd.s32 1, %s7378_s18  }
 0x398   : > { %p13_p2 = scmp.ge.s32.totalorder %s16_s18, 6  }
 0x39a   :  { %15 = sbr.rel (!%p13_p2) target bundleno = 1 (0x1), region = 78 }
 0x39f   :  { %6312 = vsyncpa [#allocation3], 1 }
 0x3a0   :  { %6314 = vsyncpa [#allocation3 + $0x1], 1 }

</bundles_post_ra>
